<compile_context>
chip_gen: v5e
topology: v5e:2x2
jax: 0.10.0
libtpu: 0.0.40
codegen_flags: <defaults>
</compile_context>

<pallas_src>
import functools

import jax
import jax.numpy as jnp
import numpy as np
from jax.experimental import pallas as pl
from jax.experimental.pallas import tpu as pltpu


def _round_up(x, m):
    return ((x + m - 1) // m) * m


def _text_rnn_kernel(ids_ref, emb_ref, w_ih_ref, w_hh_ref, b_ref,
                     w_fc_ref, b_fc_ref, h0_ref, c0_ref,
                     logits_ref, h_out_ref, c_out_ref,
                     gx_sc, h_all_sc):
    f32 = jnp.float32
    mm_dtype = w_hh_ref.dtype
    Bp, H = h0_ref.shape
    rows = gx_sc.shape[1]                    # seq_len * Bp
    seq_len = rows // Bp
    V = emb_ref.shape[0]

    # ---- (1) In-kernel embedding gather (one-hot on the MXU) + hoisted input
    #      projection for ALL timesteps, parked in VMEM scratch so it never
    #      occupies vregs across the recurrence.
    ids = ids_ref[...]                                            # (rows, 1) int32
    vlane = jax.lax.broadcasted_iota(jnp.int32, (rows, V), 1)
    onehot = jnp.where(ids == vlane, 1.0, 0.0).astype(mm_dtype)   # (rows, V)
    emb = jnp.dot(onehot, emb_ref[...],
                  preferred_element_type=f32).astype(mm_dtype)    # (rows, E)
    for k in range(4):                                            # i, f, g, o
        gx_sc[k] = jnp.dot(emb, w_ih_ref[k],
                           preferred_element_type=f32) + b_ref[k]

    h = h0_ref[...]                                               # (Bp, H) f32
    c = c0_ref[...]
    h_mm = h.astype(mm_dtype)

    # ---- (2) Serial LSTM recurrence, fully unrolled (seq_len small & static).
    #      Per step: 4 tiny (Bp,H)x(H,H) MXU matmuls against per-gate pre-split
    #      weights (every gate tile-aligned at lanes [0,H)), per-step scratch
    #      loads of the precomputed input projection, EUP tanh, a few VPU FMAs.
    #      sigmoid(x) == 0.5*tanh(0.5*x)+0.5; the 0.5 on x was pre-folded into
    #      the i/f/o weight and bias blocks by the wrapper.
    for t in range(seq_len):
        r0, r1 = t * Bp, (t + 1) * Bp
        i_a = gx_sc[0, r0:r1, :] + jnp.dot(h_mm, w_hh_ref[0], preferred_element_type=f32)
        f_a = gx_sc[1, r0:r1, :] + jnp.dot(h_mm, w_hh_ref[1], preferred_element_type=f32)
        g_a = gx_sc[2, r0:r1, :] + jnp.dot(h_mm, w_hh_ref[2], preferred_element_type=f32)
        o_a = gx_sc[3, r0:r1, :] + jnp.dot(h_mm, w_hh_ref[3], preferred_element_type=f32)

        i_g = 0.5 * jnp.tanh(i_a) + 0.5      # sigmoid(input gate)
        f_g = 0.5 * jnp.tanh(f_a) + 0.5      # sigmoid(forget gate)
        g_g = jnp.tanh(g_a)                  # cell candidate
        o_g = 0.5 * jnp.tanh(o_a) + 0.5      # sigmoid(output gate)

        c = f_g * c + i_g * g_g              # element-wise state math stays f32
        h = o_g * jnp.tanh(c)
        h_mm = h.astype(mm_dtype)            # doubles as next-step matmul LHS
        h_all_sc[r0:r1, :] = h_mm            # sublane-tile aligned store

    # Dropout is identity at inference time (eval mode).

    # ---- (3) FC projection hoisted out of the recurrence: one (rows, H) x (H, Vp)
    #      matmul with a lane-dense (Vp >= 128) output store.
    logits_ref[...] = (jnp.dot(h_all_sc[...], w_fc_ref[...],
                               preferred_element_type=f32)
                       + b_fc_ref[...]).astype(logits_ref.dtype)
    h_out_ref[...] = h.astype(h_out_ref.dtype)
    c_out_ref[...] = c.astype(c_out_ref.dtype)


@functools.partial(jax.jit, static_argnames=("matmul_dtype",))
def text_rnn_forward(token_ids, hidden, params, matmul_dtype=jnp.bfloat16):
    """Forward pass matching TextRNN.forward (eval mode).

    token_ids: (seq_len, batch, 1) int32
    hidden:    tuple of (1, batch, hidden) float32 (h0, c0)
    returns:   (logits (seq_len, batch, vocab), (h1, c1))
    """
    h0, c0 = hidden
    emb_table = params["embedding"]            # (V, E)
    w_ih = params["w_ih"]                      # (4H, E)  torch layout [i;f;g;o]
    w_hh = params["w_hh"]                      # (4H, H)
    b_ih = params["b_ih"]                      # (4H,)
    b_hh = params["b_hh"]                      # (4H,)
    w_fc = params["w_fc"]                      # (V, H)   torch layout
    b_fc = params["b_fc"]                      # (V,)

    seq_len, batch, _ = token_ids.shape
    vocab, E = emb_table.shape
    H = w_hh.shape[1]
    f32 = jnp.float32

    # Padded batch rows: multiple of the sublane tile of the matmul dtype so every
    # per-step scratch slice / store is tile aligned (8 for f32, 16 for bf16).
    sub = 8 if jnp.dtype(matmul_dtype).itemsize >= 4 else 16
    Bp = _round_up(max(batch, sub), sub)
    Vp = _round_up(max(vocab, 128), 128)       # lane-dense logits store

    # ---- token ids, padded and flattened (the only per-call input glue left).
    ids = jnp.zeros((seq_len, Bp), jnp.int32).at[:, :batch].set(token_ids[..., 0])
    ids_2d = ids.reshape(seq_len * Bp, 1)

    # ---- LSTM weights: pre-split per gate (i, f, g, o), pre-transposed for
    #      row-major matmuls, with i/f/o blocks (and biases) pre-scaled by 0.5 so
    #      the kernel evaluates sigmoid in tanh form.
    gate_scale = jnp.concatenate([jnp.full((2 * H,), 0.5, f32),   # i, f
                                  jnp.ones((H,), f32),            # g
                                  jnp.full((H,), 0.5, f32)])      # o
    w_ih_k = jnp.transpose((w_ih * gate_scale[:, None]).reshape(4, H, E),
                           (0, 2, 1)).astype(matmul_dtype)        # (4, E, H)
    w_hh_k = jnp.transpose((w_hh * gate_scale[:, None]).reshape(4, H, H),
                           (0, 2, 1)).astype(matmul_dtype)        # (4, H, H)
    b_k = (((b_ih + b_hh) * gate_scale).reshape(4, 1, H)).astype(f32)

    # ---- FC weights: pad vocab lanes only (hidden rows stay at natural H).
    w_fc_t = jnp.zeros((H, Vp), f32).at[:, :vocab].set(w_fc.T).astype(matmul_dtype)
    b_fc_r = jnp.zeros((1, Vp), f32).at[0, :vocab].set(b_fc)

    emb_t = emb_table.astype(matmul_dtype)                        # (V, E) in VMEM

    # ---- Initial state (zero-padded rows stay independent and are sliced away).
    h0_p = jnp.zeros((Bp, H), f32).at[:batch].set(h0[0])
    c0_p = jnp.zeros((Bp, H), f32).at[:batch].set(c0[0])

    vmem = pl.BlockSpec(memory_space=pltpu.MemorySpace.VMEM)
    logits2d, h1p, c1p = pl.pallas_call(
        _text_rnn_kernel,
        out_shape=(
            jax.ShapeDtypeStruct((seq_len * Bp, Vp), f32),
            jax.ShapeDtypeStruct((Bp, H), f32),
            jax.ShapeDtypeStruct((Bp, H), f32),
        ),
        in_specs=[vmem] * 9,
        out_specs=(vmem, vmem, vmem),
        scratch_shapes=[
            pltpu.VMEM((4, seq_len * Bp, H), f32),        # hoisted input projection
            pltpu.VMEM((seq_len * Bp, H), matmul_dtype),  # all h_t for the FC
        ],
    )(ids_2d, emb_t, w_ih_k, w_hh_k, b_k, w_fc_t, b_fc_r, h0_p, c0_p)

    logits = logits2d.reshape(seq_len, Bp, Vp)[:, :batch, :vocab]
    h1 = h1p[:batch][None]
    c1 = c1p[:batch][None]
    return logits, (h1, c1)


def _reference_forward(token_ids, hidden, params, matmul_dtype=jnp.float32):
    """Pure-JAX reference of the same forward pass (for verification)."""
    h0, c0 = hidden
    emb = jnp.take(params["embedding"], token_ids[..., 0], axis=0)  # (S, B, E)
    H = params["w_hh"].shape[1]
    w_ih_t = params["w_ih"].T.astype(matmul_dtype)
    w_hh_t = params["w_hh"].T.astype(matmul_dtype)
    b = (params["b_ih"] + params["b_hh"]).astype(jnp.float32)
    w_fc_t = params["w_fc"].T.astype(matmul_dtype)
    b_fc = params["b_fc"].astype(jnp.float32)

    def step(carry, x_t):
        h, c = carry
        gates = (jnp.dot(x_t.astype(matmul_dtype), w_ih_t, preferred_element_type=jnp.float32)
                 + jnp.dot(h.astype(matmul_dtype), w_hh_t, preferred_element_type=jnp.float32)
                 + b)
        i = jax.nn.sigmoid(gates[:, 0 * H:1 * H])
        f = jax.nn.sigmoid(gates[:, 1 * H:2 * H])
        g = jnp.tanh(gates[:, 2 * H:3 * H])
        o = jax.nn.sigmoid(gates[:, 3 * H:4 * H])
        c_new = f * c + i * g
        h_new = o * jnp.tanh(c_new)
        return (h_new, c_new), h_new

    (h1, c1), outs = jax.lax.scan(step, (h0[0], c0[0]), emb)
    logits = jnp.einsum('sbh,hv->sbv', outs.astype(matmul_dtype), w_fc_t,
                        preferred_element_type=jnp.float32) + b_fc
    return logits, (h1[None], c1[None])


def init_params(key, vocab, embedding_size, hidden_size):
    ks = jax.random.split(key, 7)
    s = 0.1
    return {
        "embedding": s * jax.random.normal(ks[0], (vocab, embedding_size), jnp.float32),
        "w_ih": s * jax.random.normal(ks[1], (4 * hidden_size, embedding_size), jnp.float32),
        "w_hh": s * jax.random.normal(ks[2], (4 * hidden_size, hidden_size), jnp.float32),
        "b_ih": s * jax.random.normal(ks[3], (4 * hidden_size,), jnp.float32),
        "b_hh": s * jax.random.normal(ks[4], (4 * hidden_size,), jnp.float32),
        "w_fc": s * jax.random.normal(ks[5], (vocab, hidden_size), jnp.float32),
        "b_fc": s * jax.random.normal(ks[6], (vocab,), jnp.float32),
    }


if __name__ == "__main__":
    vocab_size = 64        # input_size
    hidden_size = 32
    embedding_size = 32
    seq_len = 8
    batch = 2

    key = jax.random.PRNGKey(0)
    kp, kx = jax.random.split(key)
    params = init_params(kp, vocab_size, embedding_size, hidden_size)

    token_ids = jax.random.randint(kx, (seq_len, batch, 1), 0, vocab_size, jnp.int32)
    h0 = jnp.zeros((1, batch, hidden_size), jnp.float32)   # init_hidden()
    c0 = jnp.zeros((1, batch, hidden_size), jnp.float32)

    ref_logits, (ref_h1, ref_c1) = _reference_forward(token_ids, (h0, c0), params,
                                                      matmul_dtype=jnp.float32)

    # Strict correctness check with f32 matmul operands (near-exact path).
    logits32, (h1_32, c1_32) = text_rnn_forward(token_ids, (h0, c0), params,
                                                matmul_dtype=jnp.float32)
    jax.block_until_ready((logits32, h1_32, c1_32))
    np.testing.assert_allclose(np.asarray(logits32), np.asarray(ref_logits), atol=1e-3, rtol=1e-3)
    np.testing.assert_allclose(np.asarray(h1_32), np.asarray(ref_h1), atol=1e-3, rtol=1e-3)
    np.testing.assert_allclose(np.asarray(c1_32), np.asarray(ref_c1), atol=1e-3, rtol=1e-3)

    # bf16-MXU fast path (the default); looser numeric check.
    logits_bf, (h1_bf, c1_bf) = text_rnn_forward(token_ids, (h0, c0), params)
    jax.block_until_ready((logits_bf, h1_bf, c1_bf))
    np.testing.assert_allclose(np.asarray(logits_bf), np.asarray(ref_logits), atol=3e-2, rtol=3e-2)
    np.testing.assert_allclose(np.asarray(h1_bf), np.asarray(ref_h1), atol=3e-2, rtol=3e-2)
    np.testing.assert_allclose(np.asarray(c1_bf), np.asarray(ref_c1), atol=3e-2, rtol=3e-2)

    print("KERNEL_OK")
</pallas_src>

<mosaic_0001>
module attributes {stable_mosaic.version = 11 : i64} {
  func.func @_text_rnn_kernel(%arg0: memref<64x1xi32, #tpu.memory_space<vmem>>, %arg1: memref<64x32xf32, #tpu.memory_space<vmem>>, %arg2: memref<4x32x32xf32, #tpu.memory_space<vmem>>, %arg3: memref<4x32x32xf32, #tpu.memory_space<vmem>>, %arg4: memref<4x1x32xf32, #tpu.memory_space<vmem>>, %arg5: memref<32x128xf32, #tpu.memory_space<vmem>>, %arg6: memref<1x128xf32, #tpu.memory_space<vmem>>, %arg7: memref<8x32xf32, #tpu.memory_space<vmem>>, %arg8: memref<8x32xf32, #tpu.memory_space<vmem>>, %arg9: memref<64x128xf32, #tpu.memory_space<vmem>>, %arg10: memref<8x32xf32, #tpu.memory_space<vmem>>, %arg11: memref<8x32xf32, #tpu.memory_space<vmem>>, %arg12: memref<4x64x32xf32, #tpu.memory_space<vmem>>, %arg13: memref<64x32xf32, #tpu.memory_space<vmem>>) attributes {dimension_semantics = [], scalar_prefetch = 0 : i64, scratch_operands = 2 : i64, tpu.core_type = #tpu.core_type<tc>} {
    %c0 = arith.constant 0 : index
    %c0_0 = arith.constant 0 : index
    %0 = vector.load %arg0[%c0, %c0_0] : memref<64x1xi32, #tpu.memory_space<vmem>>, vector<64x1xi32>
    %1 = tpu.iota {dimensions = array<i32: 1>} : vector<64x64xi32>
    %2 = vector.broadcast %0 : vector<64x1xi32> to vector<64x64xi32>
    %3 = arith.cmpi eq, %2, %1 : vector<64x64xi32>
    %cst = arith.constant 1.000000e+00 : f32
    %cst_1 = arith.constant 0.000000e+00 : f32
    %4 = vector.broadcast %cst : f32 to vector<64x64xf32>
    %5 = vector.broadcast %cst_1 : f32 to vector<64x64xf32>
    %6 = arith.select %3, %4, %5 : vector<64x64xi1>, vector<64x64xf32>
    %c0_2 = arith.constant 0 : index
    %c0_3 = arith.constant 0 : index
    %7 = vector.load %arg1[%c0_2, %c0_3] : memref<64x32xf32, #tpu.memory_space<vmem>>, vector<64x32xf32>
    %cst_4 = arith.constant dense<0.000000e+00> : vector<64x32xf32>
    %8 = tpu.matmul %6, %7, %cst_4 {dimension_numbers = #tpu.dot_dimension_numbers<[1], [0], [0], [1], [0, 0, 1, 1], [], []>} : vector<64x64xf32>, vector<64x32xf32>, vector<64x32xf32> -> vector<64x32xf32>
    %c0_5 = arith.constant 0 : index
    %c0_6 = arith.constant 0 : index
    %c0_7 = arith.constant 0 : index
    %9 = vector.load %arg2[%c0_5, %c0_6, %c0_7] : memref<4x32x32xf32, #tpu.memory_space<vmem>>, vector<1x32x32xf32>
    %10 = vector.shape_cast %9 : vector<1x32x32xf32> to vector<32x32xf32>
    %cst_8 = arith.constant dense<0.000000e+00> : vector<64x32xf32>
    %11 = tpu.matmul %8, %10, %cst_8 {dimension_numbers = #tpu.dot_dimension_numbers<[1], [0], [0], [1], [0, 0, 1, 1], [], []>} : vector<64x32xf32>, vector<32x32xf32>, vector<64x32xf32> -> vector<64x32xf32>
    %c0_9 = arith.constant 0 : index
    %c0_10 = arith.constant 0 : index
    %c0_11 = arith.constant 0 : index
    %12 = vector.load %arg4[%c0_9, %c0_10, %c0_11] : memref<4x1x32xf32, #tpu.memory_space<vmem>>, vector<1x1x32xf32>
    %13 = vector.shape_cast %12 : vector<1x1x32xf32> to vector<1x32xf32>
    %14 = vector.broadcast %13 : vector<1x32xf32> to vector<64x32xf32>
    %15 = arith.addf %11, %14 : vector<64x32xf32>
    %c0_12 = arith.constant 0 : index
    %c0_13 = arith.constant 0 : index
    %c0_14 = arith.constant 0 : index
    %16 = vector.load %arg12[%c0_12, %c0_13, %c0_14] : memref<4x64x32xf32, #tpu.memory_space<vmem>>, vector<1x64x32xf32>
    %17 = vector.shape_cast %16 : vector<1x64x32xf32> to vector<64x32xf32>
    %18 = vector.shape_cast %15 : vector<64x32xf32> to vector<1x64x32xf32>
    tpu.vector_store %arg12[%c0_12, %c0_13, %c0_14], %18 {strides = array<i32>} : memref<4x64x32xf32, #tpu.memory_space<vmem>>, vector<1x64x32xf32>,
    %c1 = arith.constant 1 : index
    %c0_15 = arith.constant 0 : index
    %c0_16 = arith.constant 0 : index
    %19 = vector.load %arg2[%c1, %c0_15, %c0_16] : memref<4x32x32xf32, #tpu.memory_space<vmem>>, vector<1x32x32xf32>
    %20 = vector.shape_cast %19 : vector<1x32x32xf32> to vector<32x32xf32>
    %cst_17 = arith.constant dense<0.000000e+00> : vector<64x32xf32>
    %21 = tpu.matmul %8, %20, %cst_17 {dimension_numbers = #tpu.dot_dimension_numbers<[1], [0], [0], [1], [0, 0, 1, 1], [], []>} : vector<64x32xf32>, vector<32x32xf32>, vector<64x32xf32> -> vector<64x32xf32>
    %c1_18 = arith.constant 1 : index
    %c0_19 = arith.constant 0 : index
    %c0_20 = arith.constant 0 : index
    %22 = vector.load %arg4[%c1_18, %c0_19, %c0_20] : memref<4x1x32xf32, #tpu.memory_space<vmem>>, vector<1x1x32xf32>
    %23 = vector.shape_cast %22 : vector<1x1x32xf32> to vector<1x32xf32>
    %24 = vector.broadcast %23 : vector<1x32xf32> to vector<64x32xf32>
    %25 = arith.addf %21, %24 : vector<64x32xf32>
    %c1_21 = arith.constant 1 : index
    %c0_22 = arith.constant 0 : index
    %c0_23 = arith.constant 0 : index
    %26 = vector.load %arg12[%c1_21, %c0_22, %c0_23] : memref<4x64x32xf32, #tpu.memory_space<vmem>>, vector<1x64x32xf32>
    %27 = vector.shape_cast %26 : vector<1x64x32xf32> to vector<64x32xf32>
    %28 = vector.shape_cast %25 : vector<64x32xf32> to vector<1x64x32xf32>
    tpu.vector_store %arg12[%c1_21, %c0_22, %c0_23], %28 {strides = array<i32>} : memref<4x64x32xf32, #tpu.memory_space<vmem>>, vector<1x64x32xf32>,
    %c2 = arith.constant 2 : index
    %c0_24 = arith.constant 0 : index
    %c0_25 = arith.constant 0 : index
    %29 = vector.load %arg2[%c2, %c0_24, %c0_25] : memref<4x32x32xf32, #tpu.memory_space<vmem>>, vector<1x32x32xf32>
    %30 = vector.shape_cast %29 : vector<1x32x32xf32> to vector<32x32xf32>
    %cst_26 = arith.constant dense<0.000000e+00> : vector<64x32xf32>
    %31 = tpu.matmul %8, %30, %cst_26 {dimension_numbers = #tpu.dot_dimension_numbers<[1], [0], [0], [1], [0, 0, 1, 1], [], []>} : vector<64x32xf32>, vector<32x32xf32>, vector<64x32xf32> -> vector<64x32xf32>
    %c2_27 = arith.constant 2 : index
    %c0_28 = arith.constant 0 : index
    %c0_29 = arith.constant 0 : index
    %32 = vector.load %arg4[%c2_27, %c0_28, %c0_29] : memref<4x1x32xf32, #tpu.memory_space<vmem>>, vector<1x1x32xf32>
    %33 = vector.shape_cast %32 : vector<1x1x32xf32> to vector<1x32xf32>
    %34 = vector.broadcast %33 : vector<1x32xf32> to vector<64x32xf32>
    %35 = arith.addf %31, %34 : vector<64x32xf32>
    %c2_30 = arith.constant 2 : index
    %c0_31 = arith.constant 0 : index
    %c0_32 = arith.constant 0 : index
    %36 = vector.load %arg12[%c2_30, %c0_31, %c0_32] : memref<4x64x32xf32, #tpu.memory_space<vmem>>, vector<1x64x32xf32>
    %37 = vector.shape_cast %36 : vector<1x64x32xf32> to vector<64x32xf32>
    %38 = vector.shape_cast %35 : vector<64x32xf32> to vector<1x64x32xf32>
    tpu.vector_store %arg12[%c2_30, %c0_31, %c0_32], %38 {strides = array<i32>} : memref<4x64x32xf32, #tpu.memory_space<vmem>>, vector<1x64x32xf32>,
    %c3 = arith.constant 3 : index
    %c0_33 = arith.constant 0 : index
    %c0_34 = arith.constant 0 : index
    %39 = vector.load %arg2[%c3, %c0_33, %c0_34] : memref<4x32x32xf32, #tpu.memory_space<vmem>>, vector<1x32x32xf32>
    %40 = vector.shape_cast %39 : vector<1x32x32xf32> to vector<32x32xf32>
    %cst_35 = arith.constant dense<0.000000e+00> : vector<64x32xf32>
    %41 = tpu.matmul %8, %40, %cst_35 {dimension_numbers = #tpu.dot_dimension_numbers<[1], [0], [0], [1], [0, 0, 1, 1], [], []>} : vector<64x32xf32>, vector<32x32xf32>, vector<64x32xf32> -> vector<64x32xf32>
    %c3_36 = arith.constant 3 : index
    %c0_37 = arith.constant 0 : index
    %c0_38 = arith.constant 0 : index
    %42 = vector.load %arg4[%c3_36, %c0_37, %c0_38] : memref<4x1x32xf32, #tpu.memory_space<vmem>>, vector<1x1x32xf32>
    %43 = vector.shape_cast %42 : vector<1x1x32xf32> to vector<1x32xf32>
    %44 = vector.broadcast %43 : vector<1x32xf32> to vector<64x32xf32>
    %45 = arith.addf %41, %44 : vector<64x32xf32>
    %c3_39 = arith.constant 3 : index
    %c0_40 = arith.constant 0 : index
    %c0_41 = arith.constant 0 : index
    %46 = vector.load %arg12[%c3_39, %c0_40, %c0_41] : memref<4x64x32xf32, #tpu.memory_space<vmem>>, vector<1x64x32xf32>
    %47 = vector.shape_cast %46 : vector<1x64x32xf32> to vector<64x32xf32>
    %48 = vector.shape_cast %45 : vector<64x32xf32> to vector<1x64x32xf32>
    tpu.vector_store %arg12[%c3_39, %c0_40, %c0_41], %48 {strides = array<i32>} : memref<4x64x32xf32, #tpu.memory_space<vmem>>, vector<1x64x32xf32>,
    %c0_42 = arith.constant 0 : index
    %c0_43 = arith.constant 0 : index
    %49 = vector.load %arg7[%c0_42, %c0_43] : memref<8x32xf32, #tpu.memory_space<vmem>>, vector<8x32xf32>
    %c0_44 = arith.constant 0 : index
    %c0_45 = arith.constant 0 : index
    %50 = vector.load %arg8[%c0_44, %c0_45] : memref<8x32xf32, #tpu.memory_space<vmem>>, vector<8x32xf32>
    %c0_46 = arith.constant 0 : index
    %c0_47 = arith.constant 0 : index
    %c0_48 = arith.constant 0 : index
    %51 = vector.load %arg12[%c0_46, %c0_47, %c0_48] : memref<4x64x32xf32, #tpu.memory_space<vmem>>, vector<1x8x32xf32>
    %52 = vector.shape_cast %51 : vector<1x8x32xf32> to vector<8x32xf32>
    %c0_49 = arith.constant 0 : index
    %c0_50 = arith.constant 0 : index
    %c0_51 = arith.constant 0 : index
    %53 = vector.load %arg3[%c0_49, %c0_50, %c0_51] : memref<4x32x32xf32, #tpu.memory_space<vmem>>, vector<1x32x32xf32>
    %54 = vector.shape_cast %53 : vector<1x32x32xf32> to vector<32x32xf32>
    %cst_52 = arith.constant dense<0.000000e+00> : vector<8x32xf32>
    %55 = tpu.matmul %49, %54, %cst_52 {dimension_numbers = #tpu.dot_dimension_numbers<[1], [0], [0], [1], [0, 0, 1, 1], [], []>} : vector<8x32xf32>, vector<32x32xf32>, vector<8x32xf32> -> vector<8x32xf32>
    %56 = arith.addf %52, %55 : vector<8x32xf32>
    %c1_53 = arith.constant 1 : index
    %c0_54 = arith.constant 0 : index
    %c0_55 = arith.constant 0 : index
    %57 = vector.load %arg12[%c1_53, %c0_54, %c0_55] : memref<4x64x32xf32, #tpu.memory_space<vmem>>, vector<1x8x32xf32>
    %58 = vector.shape_cast %57 : vector<1x8x32xf32> to vector<8x32xf32>
    %c1_56 = arith.constant 1 : index
    %c0_57 = arith.constant 0 : index
    %c0_58 = arith.constant 0 : index
    %59 = vector.load %arg3[%c1_56, %c0_57, %c0_58] : memref<4x32x32xf32, #tpu.memory_space<vmem>>, vector<1x32x32xf32>
    %60 = vector.shape_cast %59 : vector<1x32x32xf32> to vector<32x32xf32>
    %cst_59 = arith.constant dense<0.000000e+00> : vector<8x32xf32>
    %61 = tpu.matmul %49, %60, %cst_59 {dimension_numbers = #tpu.dot_dimension_numbers<[1], [0], [0], [1], [0, 0, 1, 1], [], []>} : vector<8x32xf32>, vector<32x32xf32>, vector<8x32xf32> -> vector<8x32xf32>
    %62 = arith.addf %58, %61 : vector<8x32xf32>
    %c2_60 = arith.constant 2 : index
    %c0_61 = arith.constant 0 : index
    %c0_62 = arith.constant 0 : index
    %63 = vector.load %arg12[%c2_60, %c0_61, %c0_62] : memref<4x64x32xf32, #tpu.memory_space<vmem>>, vector<1x8x32xf32>
    %64 = vector.shape_cast %63 : vector<1x8x32xf32> to vector<8x32xf32>
    %c2_63 = arith.constant 2 : index
    %c0_64 = arith.constant 0 : index
    %c0_65 = arith.constant 0 : index
    %65 = vector.load %arg3[%c2_63, %c0_64, %c0_65] : memref<4x32x32xf32, #tpu.memory_space<vmem>>, vector<1x32x32xf32>
    %66 = vector.shape_cast %65 : vector<1x32x32xf32> to vector<32x32xf32>
    %cst_66 = arith.constant dense<0.000000e+00> : vector<8x32xf32>
    %67 = tpu.matmul %49, %66, %cst_66 {dimension_numbers = #tpu.dot_dimension_numbers<[1], [0], [0], [1], [0, 0, 1, 1], [], []>} : vector<8x32xf32>, vector<32x32xf32>, vector<8x32xf32> -> vector<8x32xf32>
    %68 = arith.addf %64, %67 : vector<8x32xf32>
    %c3_67 = arith.constant 3 : index
    %c0_68 = arith.constant 0 : index
    %c0_69 = arith.constant 0 : index
    %69 = vector.load %arg12[%c3_67, %c0_68, %c0_69] : memref<4x64x32xf32, #tpu.memory_space<vmem>>, vector<1x8x32xf32>
    %70 = vector.shape_cast %69 : vector<1x8x32xf32> to vector<8x32xf32>
    %c3_70 = arith.constant 3 : index
    %c0_71 = arith.constant 0 : index
    %c0_72 = arith.constant 0 : index
    %71 = vector.load %arg3[%c3_70, %c0_71, %c0_72] : memref<4x32x32xf32, #tpu.memory_space<vmem>>, vector<1x32x32xf32>
    %72 = vector.shape_cast %71 : vector<1x32x32xf32> to vector<32x32xf32>
    %cst_73 = arith.constant dense<0.000000e+00> : vector<8x32xf32>
    %73 = tpu.matmul %49, %72, %cst_73 {dimension_numbers = #tpu.dot_dimension_numbers<[1], [0], [0], [1], [0, 0, 1, 1], [], []>} : vector<8x32xf32>, vector<32x32xf32>, vector<8x32xf32> -> vector<8x32xf32>
    %74 = arith.addf %70, %73 : vector<8x32xf32>
    %75 = math.tanh %56 : vector<8x32xf32>
    %cst_74 = arith.constant 5.000000e-01 : f32
    %76 = vector.broadcast %cst_74 : f32 to vector<8x32xf32>
    %77 = arith.mulf %76, %75 : vector<8x32xf32>
    %cst_75 = arith.constant 5.000000e-01 : f32
    %78 = vector.broadcast %cst_75 : f32 to vector<8x32xf32>
    %79 = arith.addf %77, %78 : vector<8x32xf32>
    %80 = math.tanh %62 : vector<8x32xf32>
    %cst_76 = arith.constant 5.000000e-01 : f32
    %81 = vector.broadcast %cst_76 : f32 to vector<8x32xf32>
    %82 = arith.mulf %81, %80 : vector<8x32xf32>
    %cst_77 = arith.constant 5.000000e-01 : f32
    %83 = vector.broadcast %cst_77 : f32 to vector<8x32xf32>
    %84 = arith.addf %82, %83 : vector<8x32xf32>
    %85 = math.tanh %68 : vector<8x32xf32>
    %86 = math.tanh %74 : vector<8x32xf32>
    %cst_78 = arith.constant 5.000000e-01 : f32
    %87 = vector.broadcast %cst_78 : f32 to vector<8x32xf32>
    %88 = arith.mulf %87, %86 : vector<8x32xf32>
    %cst_79 = arith.constant 5.000000e-01 : f32
    %89 = vector.broadcast %cst_79 : f32 to vector<8x32xf32>
    %90 = arith.addf %88, %89 : vector<8x32xf32>
    %91 = arith.mulf %84, %50 : vector<8x32xf32>
    %92 = arith.mulf %79, %85 : vector<8x32xf32>
    %93 = arith.addf %91, %92 : vector<8x32xf32>
    %94 = math.tanh %93 : vector<8x32xf32>
    %95 = arith.mulf %90, %94 : vector<8x32xf32>
    %c0_80 = arith.constant 0 : index
    %c0_81 = arith.constant 0 : index
    %96 = vector.load %arg13[%c0_80, %c0_81] : memref<64x32xf32, #tpu.memory_space<vmem>>, vector<8x32xf32>
    tpu.vector_store %arg13[%c0_80, %c0_81], %95 {strides = array<i32>} : memref<64x32xf32, #tpu.memory_space<vmem>>, vector<8x32xf32>,
    %c0_82 = arith.constant 0 : index
    %c8 = arith.constant 8 : index
    %c0_83 = arith.constant 0 : index
    %97 = vector.load %arg12[%c0_82, %c8, %c0_83] : memref<4x64x32xf32, #tpu.memory_space<vmem>>, vector<1x8x32xf32>
    %98 = vector.shape_cast %97 : vector<1x8x32xf32> to vector<8x32xf32>
    %c0_84 = arith.constant 0 : index
    %c0_85 = arith.constant 0 : index
    %c0_86 = arith.constant 0 : index
    %99 = vector.load %arg3[%c0_84, %c0_85, %c0_86] : memref<4x32x32xf32, #tpu.memory_space<vmem>>, vector<1x32x32xf32>
    %100 = vector.shape_cast %99 : vector<1x32x32xf32> to vector<32x32xf32>
    %cst_87 = arith.constant dense<0.000000e+00> : vector<8x32xf32>
    %101 = tpu.matmul %95, %100, %cst_87 {dimension_numbers = #tpu.dot_dimension_numbers<[1], [0], [0], [1], [0, 0, 1, 1], [], []>} : vector<8x32xf32>, vector<32x32xf32>, vector<8x32xf32> -> vector<8x32xf32>
    %102 = arith.addf %98, %101 : vector<8x32xf32>
    %c1_88 = arith.constant 1 : index
    %c8_89 = arith.constant 8 : index
    %c0_90 = arith.constant 0 : index
    %103 = vector.load %arg12[%c1_88, %c8_89, %c0_90] : memref<4x64x32xf32, #tpu.memory_space<vmem>>, vector<1x8x32xf32>
    %104 = vector.shape_cast %103 : vector<1x8x32xf32> to vector<8x32xf32>
    %c1_91 = arith.constant 1 : index
    %c0_92 = arith.constant 0 : index
    %c0_93 = arith.constant 0 : index
    %105 = vector.load %arg3[%c1_91, %c0_92, %c0_93] : memref<4x32x32xf32, #tpu.memory_space<vmem>>, vector<1x32x32xf32>
    %106 = vector.shape_cast %105 : vector<1x32x32xf32> to vector<32x32xf32>
    %cst_94 = arith.constant dense<0.000000e+00> : vector<8x32xf32>
    %107 = tpu.matmul %95, %106, %cst_94 {dimension_numbers = #tpu.dot_dimension_numbers<[1], [0], [0], [1], [0, 0, 1, 1], [], []>} : vector<8x32xf32>, vector<32x32xf32>, vector<8x32xf32> -> vector<8x32xf32>
    %108 = arith.addf %104, %107 : vector<8x32xf32>
    %c2_95 = arith.constant 2 : index
    %c8_96 = arith.constant 8 : index
    %c0_97 = arith.constant 0 : index
    %109 = vector.load %arg12[%c2_95, %c8_96, %c0_97] : memref<4x64x32xf32, #tpu.memory_space<vmem>>, vector<1x8x32xf32>
    %110 = vector.shape_cast %109 : vector<1x8x32xf32> to vector<8x32xf32>
    %c2_98 = arith.constant 2 : index
    %c0_99 = arith.constant 0 : index
    %c0_100 = arith.constant 0 : index
    %111 = vector.load %arg3[%c2_98, %c0_99, %c0_100] : memref<4x32x32xf32, #tpu.memory_space<vmem>>, vector<1x32x32xf32>
    %112 = vector.shape_cast %111 : vector<1x32x32xf32> to vector<32x32xf32>
    %cst_101 = arith.constant dense<0.000000e+00> : vector<8x32xf32>
    %113 = tpu.matmul %95, %112, %cst_101 {dimension_numbers = #tpu.dot_dimension_numbers<[1], [0], [0], [1], [0, 0, 1, 1], [], []>} : vector<8x32xf32>, vector<32x32xf32>, vector<8x32xf32> -> vector<8x32xf32>
    %114 = arith.addf %110, %113 : vector<8x32xf32>
    %c3_102 = arith.constant 3 : index
    %c8_103 = arith.constant 8 : index
    %c0_104 = arith.constant 0 : index
    %115 = vector.load %arg12[%c3_102, %c8_103, %c0_104] : memref<4x64x32xf32, #tpu.memory_space<vmem>>, vector<1x8x32xf32>
    %116 = vector.shape_cast %115 : vector<1x8x32xf32> to vector<8x32xf32>
    %c3_105 = arith.constant 3 : index
    %c0_106 = arith.constant 0 : index
    %c0_107 = arith.constant 0 : index
    %117 = vector.load %arg3[%c3_105, %c0_106, %c0_107] : memref<4x32x32xf32, #tpu.memory_space<vmem>>, vector<1x32x32xf32>
    %118 = vector.shape_cast %117 : vector<1x32x32xf32> to vector<32x32xf32>
    %cst_108 = arith.constant dense<0.000000e+00> : vector<8x32xf32>
    %119 = tpu.matmul %95, %118, %cst_108 {dimension_numbers = #tpu.dot_dimension_numbers<[1], [0], [0], [1], [0, 0, 1, 1], [], []>} : vector<8x32xf32>, vector<32x32xf32>, vector<8x32xf32> -> vector<8x32xf32>
    %120 = arith.addf %116, %119 : vector<8x32xf32>
    %121 = math.tanh %102 : vector<8x32xf32>
    %cst_109 = arith.constant 5.000000e-01 : f32
    %122 = vector.broadcast %cst_109 : f32 to vector<8x32xf32>
    %123 = arith.mulf %122, %121 : vector<8x32xf32>
    %cst_110 = arith.constant 5.000000e-01 : f32
    %124 = vector.broadcast %cst_110 : f32 to vector<8x32xf32>
    %125 = arith.addf %123, %124 : vector<8x32xf32>
    %126 = math.tanh %108 : vector<8x32xf32>
    %cst_111 = arith.constant 5.000000e-01 : f32
    %127 = vector.broadcast %cst_111 : f32 to vector<8x32xf32>
    %128 = arith.mulf %127, %126 : vector<8x32xf32>
    %cst_112 = arith.constant 5.000000e-01 : f32
    %129 = vector.broadcast %cst_112 : f32 to vector<8x32xf32>
    %130 = arith.addf %128, %129 : vector<8x32xf32>
    %131 = math.tanh %114 : vector<8x32xf32>
    %132 = math.tanh %120 : vector<8x32xf32>
    %cst_113 = arith.constant 5.000000e-01 : f32
    %133 = vector.broadcast %cst_113 : f32 to vector<8x32xf32>
    %134 = arith.mulf %133, %132 : vector<8x32xf32>
    %cst_114 = arith.constant 5.000000e-01 : f32
    %135 = vector.broadcast %cst_114 : f32 to vector<8x32xf32>
    %136 = arith.addf %134, %135 : vector<8x32xf32>
    %137 = arith.mulf %130, %93 : vector<8x32xf32>
    %138 = arith.mulf %125, %131 : vector<8x32xf32>
    %139 = arith.addf %137, %138 : vector<8x32xf32>
    %140 = math.tanh %139 : vector<8x32xf32>
    %141 = arith.mulf %136, %140 : vector<8x32xf32>
    %c8_115 = arith.constant 8 : index
    %c0_116 = arith.constant 0 : index
    %142 = vector.load %arg13[%c8_115, %c0_116] : memref<64x32xf32, #tpu.memory_space<vmem>>, vector<8x32xf32>
    tpu.vector_store %arg13[%c8_115, %c0_116], %141 {strides = array<i32>} : memref<64x32xf32, #tpu.memory_space<vmem>>, vector<8x32xf32>,
    %c0_117 = arith.constant 0 : index
    %c16 = arith.constant 16 : index
    %c0_118 = arith.constant 0 : index
    %143 = vector.load %arg12[%c0_117, %c16, %c0_118] : memref<4x64x32xf32, #tpu.memory_space<vmem>>, vector<1x8x32xf32>
    %144 = vector.shape_cast %143 : vector<1x8x32xf32> to vector<8x32xf32>
    %c0_119 = arith.constant 0 : index
    %c0_120 = arith.constant 0 : index
    %c0_121 = arith.constant 0 : index
    %145 = vector.load %arg3[%c0_119, %c0_120, %c0_121] : memref<4x32x32xf32, #tpu.memory_space<vmem>>, vector<1x32x32xf32>
    %146 = vector.shape_cast %145 : vector<1x32x32xf32> to vector<32x32xf32>
    %cst_122 = arith.constant dense<0.000000e+00> : vector<8x32xf32>
    %147 = tpu.matmul %141, %146, %cst_122 {dimension_numbers = #tpu.dot_dimension_numbers<[1], [0], [0], [1], [0, 0, 1, 1], [], []>} : vector<8x32xf32>, vector<32x32xf32>, vector<8x32xf32> -> vector<8x32xf32>
    %148 = arith.addf %144, %147 : vector<8x32xf32>
    %c1_123 = arith.constant 1 : index
    %c16_124 = arith.constant 16 : index
    %c0_125 = arith.constant 0 : index
    %149 = vector.load %arg12[%c1_123, %c16_124, %c0_125] : memref<4x64x32xf32, #tpu.memory_space<vmem>>, vector<1x8x32xf32>
    %150 = vector.shape_cast %149 : vector<1x8x32xf32> to vector<8x32xf32>
    %c1_126 = arith.constant 1 : index
    %c0_127 = arith.constant 0 : index
    %c0_128 = arith.constant 0 : index
    %151 = vector.load %arg3[%c1_126, %c0_127, %c0_128] : memref<4x32x32xf32, #tpu.memory_space<vmem>>, vector<1x32x32xf32>
    %152 = vector.shape_cast %151 : vector<1x32x32xf32> to vector<32x32xf32>
    %cst_129 = arith.constant dense<0.000000e+00> : vector<8x32xf32>
    %153 = tpu.matmul %141, %152, %cst_129 {dimension_numbers = #tpu.dot_dimension_numbers<[1], [0], [0], [1], [0, 0, 1, 1], [], []>} : vector<8x32xf32>, vector<32x32xf32>, vector<8x32xf32> -> vector<8x32xf32>
    %154 = arith.addf %150, %153 : vector<8x32xf32>
    %c2_130 = arith.constant 2 : index
    %c16_131 = arith.constant 16 : index
    %c0_132 = arith.constant 0 : index
    %155 = vector.load %arg12[%c2_130, %c16_131, %c0_132] : memref<4x64x32xf32, #tpu.memory_space<vmem>>, vector<1x8x32xf32>
    %156 = vector.shape_cast %155 : vector<1x8x32xf32> to vector<8x32xf32>
    %c2_133 = arith.constant 2 : index
    %c0_134 = arith.constant 0 : index
    %c0_135 = arith.constant 0 : index
    %157 = vector.load %arg3[%c2_133, %c0_134, %c0_135] : memref<4x32x32xf32, #tpu.memory_space<vmem>>, vector<1x32x32xf32>
    %158 = vector.shape_cast %157 : vector<1x32x32xf32> to vector<32x32xf32>
    %cst_136 = arith.constant dense<0.000000e+00> : vector<8x32xf32>
    %159 = tpu.matmul %141, %158, %cst_136 {dimension_numbers = #tpu.dot_dimension_numbers<[1], [0], [0], [1], [0, 0, 1, 1], [], []>} : vector<8x32xf32>, vector<32x32xf32>, vector<8x32xf32> -> vector<8x32xf32>
    %160 = arith.addf %156, %159 : vector<8x32xf32>
    %c3_137 = arith.constant 3 : index
    %c16_138 = arith.constant 16 : index
    %c0_139 = arith.constant 0 : index
    %161 = vector.load %arg12[%c3_137, %c16_138, %c0_139] : memref<4x64x32xf32, #tpu.memory_space<vmem>>, vector<1x8x32xf32>
    %162 = vector.shape_cast %161 : vector<1x8x32xf32> to vector<8x32xf32>
    %c3_140 = arith.constant 3 : index
    %c0_141 = arith.constant 0 : index
    %c0_142 = arith.constant 0 : index
    %163 = vector.load %arg3[%c3_140, %c0_141, %c0_142] : memref<4x32x32xf32, #tpu.memory_space<vmem>>, vector<1x32x32xf32>
    %164 = vector.shape_cast %163 : vector<1x32x32xf32> to vector<32x32xf32>
    %cst_143 = arith.constant dense<0.000000e+00> : vector<8x32xf32>
    %165 = tpu.matmul %141, %164, %cst_143 {dimension_numbers = #tpu.dot_dimension_numbers<[1], [0], [0], [1], [0, 0, 1, 1], [], []>} : vector<8x32xf32>, vector<32x32xf32>, vector<8x32xf32> -> vector<8x32xf32>
    %166 = arith.addf %162, %165 : vector<8x32xf32>
    %167 = math.tanh %148 : vector<8x32xf32>
    %cst_144 = arith.constant 5.000000e-01 : f32
    %168 = vector.broadcast %cst_144 : f32 to vector<8x32xf32>
    %169 = arith.mulf %168, %167 : vector<8x32xf32>
    %cst_145 = arith.constant 5.000000e-01 : f32
    %170 = vector.broadcast %cst_145 : f32 to vector<8x32xf32>
    %171 = arith.addf %169, %170 : vector<8x32xf32>
    %172 = math.tanh %154 : vector<8x32xf32>
    %cst_146 = arith.constant 5.000000e-01 : f32
    %173 = vector.broadcast %cst_146 : f32 to vector<8x32xf32>
    %174 = arith.mulf %173, %172 : vector<8x32xf32>
    %cst_147 = arith.constant 5.000000e-01 : f32
    %175 = vector.broadcast %cst_147 : f32 to vector<8x32xf32>
    %176 = arith.addf %174, %175 : vector<8x32xf32>
    %177 = math.tanh %160 : vector<8x32xf32>
    %178 = math.tanh %166 : vector<8x32xf32>
    %cst_148 = arith.constant 5.000000e-01 : f32
    %179 = vector.broadcast %cst_148 : f32 to vector<8x32xf32>
    %180 = arith.mulf %179, %178 : vector<8x32xf32>
    %cst_149 = arith.constant 5.000000e-01 : f32
    %181 = vector.broadcast %cst_149 : f32 to vector<8x32xf32>
    %182 = arith.addf %180, %181 : vector<8x32xf32>
    %183 = arith.mulf %176, %139 : vector<8x32xf32>
    %184 = arith.mulf %171, %177 : vector<8x32xf32>
    %185 = arith.addf %183, %184 : vector<8x32xf32>
    %186 = math.tanh %185 : vector<8x32xf32>
    %187 = arith.mulf %182, %186 : vector<8x32xf32>
    %c16_150 = arith.constant 16 : index
    %c0_151 = arith.constant 0 : index
    %188 = vector.load %arg13[%c16_150, %c0_151] : memref<64x32xf32, #tpu.memory_space<vmem>>, vector<8x32xf32>
    tpu.vector_store %arg13[%c16_150, %c0_151], %187 {strides = array<i32>} : memref<64x32xf32, #tpu.memory_space<vmem>>, vector<8x32xf32>,
    %c0_152 = arith.constant 0 : index
    %c24 = arith.constant 24 : index
    %c0_153 = arith.constant 0 : index
    %189 = vector.load %arg12[%c0_152, %c24, %c0_153] : memref<4x64x32xf32, #tpu.memory_space<vmem>>, vector<1x8x32xf32>
    %190 = vector.shape_cast %189 : vector<1x8x32xf32> to vector<8x32xf32>
    %c0_154 = arith.constant 0 : index
    %c0_155 = arith.constant 0 : index
    %c0_156 = arith.constant 0 : index
    %191 = vector.load %arg3[%c0_154, %c0_155, %c0_156] : memref<4x32x32xf32, #tpu.memory_space<vmem>>, vector<1x32x32xf32>
    %192 = vector.shape_cast %191 : vector<1x32x32xf32> to vector<32x32xf32>
    %cst_157 = arith.constant dense<0.000000e+00> : vector<8x32xf32>
    %193 = tpu.matmul %187, %192, %cst_157 {dimension_numbers = #tpu.dot_dimension_numbers<[1], [0], [0], [1], [0, 0, 1, 1], [], []>} : vector<8x32xf32>, vector<32x32xf32>, vector<8x32xf32> -> vector<8x32xf32>
    %194 = arith.addf %190, %193 : vector<8x32xf32>
    %c1_158 = arith.constant 1 : index
    %c24_159 = arith.constant 24 : index
    %c0_160 = arith.constant 0 : index
    %195 = vector.load %arg12[%c1_158, %c24_159, %c0_160] : memref<4x64x32xf32, #tpu.memory_space<vmem>>, vector<1x8x32xf32>
    %196 = vector.shape_cast %195 : vector<1x8x32xf32> to vector<8x32xf32>
    %c1_161 = arith.constant 1 : index
    %c0_162 = arith.constant 0 : index
    %c0_163 = arith.constant 0 : index
    %197 = vector.load %arg3[%c1_161, %c0_162, %c0_163] : memref<4x32x32xf32, #tpu.memory_space<vmem>>, vector<1x32x32xf32>
    %198 = vector.shape_cast %197 : vector<1x32x32xf32> to vector<32x32xf32>
    %cst_164 = arith.constant dense<0.000000e+00> : vector<8x32xf32>
    %199 = tpu.matmul %187, %198, %cst_164 {dimension_numbers = #tpu.dot_dimension_numbers<[1], [0], [0], [1], [0, 0, 1, 1], [], []>} : vector<8x32xf32>, vector<32x32xf32>, vector<8x32xf32> -> vector<8x32xf32>
    %200 = arith.addf %196, %199 : vector<8x32xf32>
    %c2_165 = arith.constant 2 : index
    %c24_166 = arith.constant 24 : index
    %c0_167 = arith.constant 0 : index
    %201 = vector.load %arg12[%c2_165, %c24_166, %c0_167] : memref<4x64x32xf32, #tpu.memory_space<vmem>>, vector<1x8x32xf32>
    %202 = vector.shape_cast %201 : vector<1x8x32xf32> to vector<8x32xf32>
    %c2_168 = arith.constant 2 : index
    %c0_169 = arith.constant 0 : index
    %c0_170 = arith.constant 0 : index
    %203 = vector.load %arg3[%c2_168, %c0_169, %c0_170] : memref<4x32x32xf32, #tpu.memory_space<vmem>>, vector<1x32x32xf32>
    %204 = vector.shape_cast %203 : vector<1x32x32xf32> to vector<32x32xf32>
    %cst_171 = arith.constant dense<0.000000e+00> : vector<8x32xf32>
    %205 = tpu.matmul %187, %204, %cst_171 {dimension_numbers = #tpu.dot_dimension_numbers<[1], [0], [0], [1], [0, 0, 1, 1], [], []>} : vector<8x32xf32>, vector<32x32xf32>, vector<8x32xf32> -> vector<8x32xf32>
    %206 = arith.addf %202, %205 : vector<8x32xf32>
    %c3_172 = arith.constant 3 : index
    %c24_173 = arith.constant 24 : index
    %c0_174 = arith.constant 0 : index
    %207 = vector.load %arg12[%c3_172, %c24_173, %c0_174] : memref<4x64x32xf32, #tpu.memory_space<vmem>>, vector<1x8x32xf32>
    %208 = vector.shape_cast %207 : vector<1x8x32xf32> to vector<8x32xf32>
    %c3_175 = arith.constant 3 : index
    %c0_176 = arith.constant 0 : index
    %c0_177 = arith.constant 0 : index
    %209 = vector.load %arg3[%c3_175, %c0_176, %c0_177] : memref<4x32x32xf32, #tpu.memory_space<vmem>>, vector<1x32x32xf32>
    %210 = vector.shape_cast %209 : vector<1x32x32xf32> to vector<32x32xf32>
    %cst_178 = arith.constant dense<0.000000e+00> : vector<8x32xf32>
    %211 = tpu.matmul %187, %210, %cst_178 {dimension_numbers = #tpu.dot_dimension_numbers<[1], [0], [0], [1], [0, 0, 1, 1], [], []>} : vector<8x32xf32>, vector<32x32xf32>, vector<8x32xf32> -> vector<8x32xf32>
    %212 = arith.addf %208, %211 : vector<8x32xf32>
    %213 = math.tanh %194 : vector<8x32xf32>
    %cst_179 = arith.constant 5.000000e-01 : f32
    %214 = vector.broadcast %cst_179 : f32 to vector<8x32xf32>
    %215 = arith.mulf %214, %213 : vector<8x32xf32>
    %cst_180 = arith.constant 5.000000e-01 : f32
    %216 = vector.broadcast %cst_180 : f32 to vector<8x32xf32>
    %217 = arith.addf %215, %216 : vector<8x32xf32>
    %218 = math.tanh %200 : vector<8x32xf32>
    %cst_181 = arith.constant 5.000000e-01 : f32
    %219 = vector.broadcast %cst_181 : f32 to vector<8x32xf32>
    %220 = arith.mulf %219, %218 : vector<8x32xf32>
    %cst_182 = arith.constant 5.000000e-01 : f32
    %221 = vector.broadcast %cst_182 : f32 to vector<8x32xf32>
    %222 = arith.addf %220, %221 : vector<8x32xf32>
    %223 = math.tanh %206 : vector<8x32xf32>
    %224 = math.tanh %212 : vector<8x32xf32>
    %cst_183 = arith.constant 5.000000e-01 : f32
    %225 = vector.broadcast %cst_183 : f32 to vector<8x32xf32>
    %226 = arith.mulf %225, %224 : vector<8x32xf32>
    %cst_184 = arith.constant 5.000000e-01 : f32
    %227 = vector.broadcast %cst_184 : f32 to vector<8x32xf32>
    %228 = arith.addf %226, %227 : vector<8x32xf32>
    %229 = arith.mulf %222, %185 : vector<8x32xf32>
    %230 = arith.mulf %217, %223 : vector<8x32xf32>
    %231 = arith.addf %229, %230 : vector<8x32xf32>
    %232 = math.tanh %231 : vector<8x32xf32>
    %233 = arith.mulf %228, %232 : vector<8x32xf32>
    %c24_185 = arith.constant 24 : index
    %c0_186 = arith.constant 0 : index
    %234 = vector.load %arg13[%c24_185, %c0_186] : memref<64x32xf32, #tpu.memory_space<vmem>>, vector<8x32xf32>
    tpu.vector_store %arg13[%c24_185, %c0_186], %233 {strides = array<i32>} : memref<64x32xf32, #tpu.memory_space<vmem>>, vector<8x32xf32>,
    %c0_187 = arith.constant 0 : index
    %c32 = arith.constant 32 : index
    %c0_188 = arith.constant 0 : index
    %235 = vector.load %arg12[%c0_187, %c32, %c0_188] : memref<4x64x32xf32, #tpu.memory_space<vmem>>, vector<1x8x32xf32>
    %236 = vector.shape_cast %235 : vector<1x8x32xf32> to vector<8x32xf32>
    %c0_189 = arith.constant 0 : index
    %c0_190 = arith.constant 0 : index
    %c0_191 = arith.constant 0 : index
    %237 = vector.load %arg3[%c0_189, %c0_190, %c0_191] : memref<4x32x32xf32, #tpu.memory_space<vmem>>, vector<1x32x32xf32>
    %238 = vector.shape_cast %237 : vector<1x32x32xf32> to vector<32x32xf32>
    %cst_192 = arith.constant dense<0.000000e+00> : vector<8x32xf32>
    %239 = tpu.matmul %233, %238, %cst_192 {dimension_numbers = #tpu.dot_dimension_numbers<[1], [0], [0], [1], [0, 0, 1, 1], [], []>} : vector<8x32xf32>, vector<32x32xf32>, vector<8x32xf32> -> vector<8x32xf32>
    %240 = arith.addf %236, %239 : vector<8x32xf32>
    %c1_193 = arith.constant 1 : index
    %c32_194 = arith.constant 32 : index
    %c0_195 = arith.constant 0 : index
    %241 = vector.load %arg12[%c1_193, %c32_194, %c0_195] : memref<4x64x32xf32, #tpu.memory_space<vmem>>, vector<1x8x32xf32>
    %242 = vector.shape_cast %241 : vector<1x8x32xf32> to vector<8x32xf32>
    %c1_196 = arith.constant 1 : index
    %c0_197 = arith.constant 0 : index
    %c0_198 = arith.constant 0 : index
    %243 = vector.load %arg3[%c1_196, %c0_197, %c0_198] : memref<4x32x32xf32, #tpu.memory_space<vmem>>, vector<1x32x32xf32>
    %244 = vector.shape_cast %243 : vector<1x32x32xf32> to vector<32x32xf32>
    %cst_199 = arith.constant dense<0.000000e+00> : vector<8x32xf32>
    %245 = tpu.matmul %233, %244, %cst_199 {dimension_numbers = #tpu.dot_dimension_numbers<[1], [0], [0], [1], [0, 0, 1, 1], [], []>} : vector<8x32xf32>, vector<32x32xf32>, vector<8x32xf32> -> vector<8x32xf32>
    %246 = arith.addf %242, %245 : vector<8x32xf32>
    %c2_200 = arith.constant 2 : index
    %c32_201 = arith.constant 32 : index
    %c0_202 = arith.constant 0 : index
    %247 = vector.load %arg12[%c2_200, %c32_201, %c0_202] : memref<4x64x32xf32, #tpu.memory_space<vmem>>, vector<1x8x32xf32>
    %248 = vector.shape_cast %247 : vector<1x8x32xf32> to vector<8x32xf32>
    %c2_203 = arith.constant 2 : index
    %c0_204 = arith.constant 0 : index
    %c0_205 = arith.constant 0 : index
    %249 = vector.load %arg3[%c2_203, %c0_204, %c0_205] : memref<4x32x32xf32, #tpu.memory_space<vmem>>, vector<1x32x32xf32>
    %250 = vector.shape_cast %249 : vector<1x32x32xf32> to vector<32x32xf32>
    %cst_206 = arith.constant dense<0.000000e+00> : vector<8x32xf32>
    %251 = tpu.matmul %233, %250, %cst_206 {dimension_numbers = #tpu.dot_dimension_numbers<[1], [0], [0], [1], [0, 0, 1, 1], [], []>} : vector<8x32xf32>, vector<32x32xf32>, vector<8x32xf32> -> vector<8x32xf32>
    %252 = arith.addf %248, %251 : vector<8x32xf32>
    %c3_207 = arith.constant 3 : index
    %c32_208 = arith.constant 32 : index
    %c0_209 = arith.constant 0 : index
    %253 = vector.load %arg12[%c3_207, %c32_208, %c0_209] : memref<4x64x32xf32, #tpu.memory_space<vmem>>, vector<1x8x32xf32>
    %254 = vector.shape_cast %253 : vector<1x8x32xf32> to vector<8x32xf32>
    %c3_210 = arith.constant 3 : index
    %c0_211 = arith.constant 0 : index
    %c0_212 = arith.constant 0 : index
    %255 = vector.load %arg3[%c3_210, %c0_211, %c0_212] : memref<4x32x32xf32, #tpu.memory_space<vmem>>, vector<1x32x32xf32>
    %256 = vector.shape_cast %255 : vector<1x32x32xf32> to vector<32x32xf32>
    %cst_213 = arith.constant dense<0.000000e+00> : vector<8x32xf32>
    %257 = tpu.matmul %233, %256, %cst_213 {dimension_numbers = #tpu.dot_dimension_numbers<[1], [0], [0], [1], [0, 0, 1, 1], [], []>} : vector<8x32xf32>, vector<32x32xf32>, vector<8x32xf32> -> vector<8x32xf32>
    %258 = arith.addf %254, %257 : vector<8x32xf32>
    %259 = math.tanh %240 : vector<8x32xf32>
    %cst_214 = arith.constant 5.000000e-01 : f32
    %260 = vector.broadcast %cst_214 : f32 to vector<8x32xf32>
    %261 = arith.mulf %260, %259 : vector<8x32xf32>
    %cst_215 = arith.constant 5.000000e-01 : f32
    %262 = vector.broadcast %cst_215 : f32 to vector<8x32xf32>
    %263 = arith.addf %261, %262 : vector<8x32xf32>
    %264 = math.tanh %246 : vector<8x32xf32>
    %cst_216 = arith.constant 5.000000e-01 : f32
    %265 = vector.broadcast %cst_216 : f32 to vector<8x32xf32>
    %266 = arith.mulf %265, %264 : vector<8x32xf32>
    %cst_217 = arith.constant 5.000000e-01 : f32
    %267 = vector.broadcast %cst_217 : f32 to vector<8x32xf32>
    %268 = arith.addf %266, %267 : vector<8x32xf32>
    %269 = math.tanh %252 : vector<8x32xf32>
    %270 = math.tanh %258 : vector<8x32xf32>
    %cst_218 = arith.constant 5.000000e-01 : f32
    %271 = vector.broadcast %cst_218 : f32 to vector<8x32xf32>
    %272 = arith.mulf %271, %270 : vector<8x32xf32>
    %cst_219 = arith.constant 5.000000e-01 : f32
    %273 = vector.broadcast %cst_219 : f32 to vector<8x32xf32>
    %274 = arith.addf %272, %273 : vector<8x32xf32>
    %275 = arith.mulf %268, %231 : vector<8x32xf32>
    %276 = arith.mulf %263, %269 : vector<8x32xf32>
    %277 = arith.addf %275, %276 : vector<8x32xf32>
    %278 = math.tanh %277 : vector<8x32xf32>
    %279 = arith.mulf %274, %278 : vector<8x32xf32>
    %c32_220 = arith.constant 32 : index
    %c0_221 = arith.constant 0 : index
    %280 = vector.load %arg13[%c32_220, %c0_221] : memref<64x32xf32, #tpu.memory_space<vmem>>, vector<8x32xf32>
    tpu.vector_store %arg13[%c32_220, %c0_221], %279 {strides = array<i32>} : memref<64x32xf32, #tpu.memory_space<vmem>>, vector<8x32xf32>,
    %c0_222 = arith.constant 0 : index
    %c40 = arith.constant 40 : index
    %c0_223 = arith.constant 0 : index
    %281 = vector.load %arg12[%c0_222, %c40, %c0_223] : memref<4x64x32xf32, #tpu.memory_space<vmem>>, vector<1x8x32xf32>
    %282 = vector.shape_cast %281 : vector<1x8x32xf32> to vector<8x32xf32>
    %c0_224 = arith.constant 0 : index
    %c0_225 = arith.constant 0 : index
    %c0_226 = arith.constant 0 : index
    %283 = vector.load %arg3[%c0_224, %c0_225, %c0_226] : memref<4x32x32xf32, #tpu.memory_space<vmem>>, vector<1x32x32xf32>
    %284 = vector.shape_cast %283 : vector<1x32x32xf32> to vector<32x32xf32>
    %cst_227 = arith.constant dense<0.000000e+00> : vector<8x32xf32>
    %285 = tpu.matmul %279, %284, %cst_227 {dimension_numbers = #tpu.dot_dimension_numbers<[1], [0], [0], [1], [0, 0, 1, 1], [], []>} : vector<8x32xf32>, vector<32x32xf32>, vector<8x32xf32> -> vector<8x32xf32>
    %286 = arith.addf %282, %285 : vector<8x32xf32>
    %c1_228 = arith.constant 1 : index
    %c40_229 = arith.constant 40 : index
    %c0_230 = arith.constant 0 : index
    %287 = vector.load %arg12[%c1_228, %c40_229, %c0_230] : memref<4x64x32xf32, #tpu.memory_space<vmem>>, vector<1x8x32xf32>
    %288 = vector.shape_cast %287 : vector<1x8x32xf32> to vector<8x32xf32>
    %c1_231 = arith.constant 1 : index
    %c0_232 = arith.constant 0 : index
    %c0_233 = arith.constant 0 : index
    %289 = vector.load %arg3[%c1_231, %c0_232, %c0_233] : memref<4x32x32xf32, #tpu.memory_space<vmem>>, vector<1x32x32xf32>
    %290 = vector.shape_cast %289 : vector<1x32x32xf32> to vector<32x32xf32>
    %cst_234 = arith.constant dense<0.000000e+00> : vector<8x32xf32>
    %291 = tpu.matmul %279, %290, %cst_234 {dimension_numbers = #tpu.dot_dimension_numbers<[1], [0], [0], [1], [0, 0, 1, 1], [], []>} : vector<8x32xf32>, vector<32x32xf32>, vector<8x32xf32> -> vector<8x32xf32>
    %292 = arith.addf %288, %291 : vector<8x32xf32>
    %c2_235 = arith.constant 2 : index
    %c40_236 = arith.constant 40 : index
    %c0_237 = arith.constant 0 : index
    %293 = vector.load %arg12[%c2_235, %c40_236, %c0_237] : memref<4x64x32xf32, #tpu.memory_space<vmem>>, vector<1x8x32xf32>
    %294 = vector.shape_cast %293 : vector<1x8x32xf32> to vector<8x32xf32>
    %c2_238 = arith.constant 2 : index
    %c0_239 = arith.constant 0 : index
    %c0_240 = arith.constant 0 : index
    %295 = vector.load %arg3[%c2_238, %c0_239, %c0_240] : memref<4x32x32xf32, #tpu.memory_space<vmem>>, vector<1x32x32xf32>
    %296 = vector.shape_cast %295 : vector<1x32x32xf32> to vector<32x32xf32>
    %cst_241 = arith.constant dense<0.000000e+00> : vector<8x32xf32>
    %297 = tpu.matmul %279, %296, %cst_241 {dimension_numbers = #tpu.dot_dimension_numbers<[1], [0], [0], [1], [0, 0, 1, 1], [], []>} : vector<8x32xf32>, vector<32x32xf32>, vector<8x32xf32> -> vector<8x32xf32>
    %298 = arith.addf %294, %297 : vector<8x32xf32>
    %c3_242 = arith.constant 3 : index
    %c40_243 = arith.constant 40 : index
    %c0_244 = arith.constant 0 : index
    %299 = vector.load %arg12[%c3_242, %c40_243, %c0_244] : memref<4x64x32xf32, #tpu.memory_space<vmem>>, vector<1x8x32xf32>
    %300 = vector.shape_cast %299 : vector<1x8x32xf32> to vector<8x32xf32>
    %c3_245 = arith.constant 3 : index
    %c0_246 = arith.constant 0 : index
    %c0_247 = arith.constant 0 : index
    %301 = vector.load %arg3[%c3_245, %c0_246, %c0_247] : memref<4x32x32xf32, #tpu.memory_space<vmem>>, vector<1x32x32xf32>
    %302 = vector.shape_cast %301 : vector<1x32x32xf32> to vector<32x32xf32>
    %cst_248 = arith.constant dense<0.000000e+00> : vector<8x32xf32>
    %303 = tpu.matmul %279, %302, %cst_248 {dimension_numbers = #tpu.dot_dimension_numbers<[1], [0], [0], [1], [0, 0, 1, 1], [], []>} : vector<8x32xf32>, vector<32x32xf32>, vector<8x32xf32> -> vector<8x32xf32>
    %304 = arith.addf %300, %303 : vector<8x32xf32>
    %305 = math.tanh %286 : vector<8x32xf32>
    %cst_249 = arith.constant 5.000000e-01 : f32
    %306 = vector.broadcast %cst_249 : f32 to vector<8x32xf32>
    %307 = arith.mulf %306, %305 : vector<8x32xf32>
    %cst_250 = arith.constant 5.000000e-01 : f32
    %308 = vector.broadcast %cst_250 : f32 to vector<8x32xf32>
    %309 = arith.addf %307, %308 : vector<8x32xf32>
    %310 = math.tanh %292 : vector<8x32xf32>
    %cst_251 = arith.constant 5.000000e-01 : f32
    %311 = vector.broadcast %cst_251 : f32 to vector<8x32xf32>
    %312 = arith.mulf %311, %310 : vector<8x32xf32>
    %cst_252 = arith.constant 5.000000e-01 : f32
    %313 = vector.broadcast %cst_252 : f32 to vector<8x32xf32>
    %314 = arith.addf %312, %313 : vector<8x32xf32>
    %315 = math.tanh %298 : vector<8x32xf32>
    %316 = math.tanh %304 : vector<8x32xf32>
    %cst_253 = arith.constant 5.000000e-01 : f32
    %317 = vector.broadcast %cst_253 : f32 to vector<8x32xf32>
    %318 = arith.mulf %317, %316 : vector<8x32xf32>
    %cst_254 = arith.constant 5.000000e-01 : f32
    %319 = vector.broadcast %cst_254 : f32 to vector<8x32xf32>
    %320 = arith.addf %318, %319 : vector<8x32xf32>
    %321 = arith.mulf %314, %277 : vector<8x32xf32>
    %322 = arith.mulf %309, %315 : vector<8x32xf32>
    %323 = arith.addf %321, %322 : vector<8x32xf32>
    %324 = math.tanh %323 : vector<8x32xf32>
    %325 = arith.mulf %320, %324 : vector<8x32xf32>
    %c40_255 = arith.constant 40 : index
    %c0_256 = arith.constant 0 : index
    %326 = vector.load %arg13[%c40_255, %c0_256] : memref<64x32xf32, #tpu.memory_space<vmem>>, vector<8x32xf32>
    tpu.vector_store %arg13[%c40_255, %c0_256], %325 {strides = array<i32>} : memref<64x32xf32, #tpu.memory_space<vmem>>, vector<8x32xf32>,
    %c0_257 = arith.constant 0 : index
    %c48 = arith.constant 48 : index
    %c0_258 = arith.constant 0 : index
    %327 = vector.load %arg12[%c0_257, %c48, %c0_258] : memref<4x64x32xf32, #tpu.memory_space<vmem>>, vector<1x8x32xf32>
    %328 = vector.shape_cast %327 : vector<1x8x32xf32> to vector<8x32xf32>
    %c0_259 = arith.constant 0 : index
    %c0_260 = arith.constant 0 : index
    %c0_261 = arith.constant 0 : index
    %329 = vector.load %arg3[%c0_259, %c0_260, %c0_261] : memref<4x32x32xf32, #tpu.memory_space<vmem>>, vector<1x32x32xf32>
    %330 = vector.shape_cast %329 : vector<1x32x32xf32> to vector<32x32xf32>
    %cst_262 = arith.constant dense<0.000000e+00> : vector<8x32xf32>
    %331 = tpu.matmul %325, %330, %cst_262 {dimension_numbers = #tpu.dot_dimension_numbers<[1], [0], [0], [1], [0, 0, 1, 1], [], []>} : vector<8x32xf32>, vector<32x32xf32>, vector<8x32xf32> -> vector<8x32xf32>
    %332 = arith.addf %328, %331 : vector<8x32xf32>
    %c1_263 = arith.constant 1 : index
    %c48_264 = arith.constant 48 : index
    %c0_265 = arith.constant 0 : index
    %333 = vector.load %arg12[%c1_263, %c48_264, %c0_265] : memref<4x64x32xf32, #tpu.memory_space<vmem>>, vector<1x8x32xf32>
    %334 = vector.shape_cast %333 : vector<1x8x32xf32> to vector<8x32xf32>
    %c1_266 = arith.constant 1 : index
    %c0_267 = arith.constant 0 : index
    %c0_268 = arith.constant 0 : index
    %335 = vector.load %arg3[%c1_266, %c0_267, %c0_268] : memref<4x32x32xf32, #tpu.memory_space<vmem>>, vector<1x32x32xf32>
    %336 = vector.shape_cast %335 : vector<1x32x32xf32> to vector<32x32xf32>
    %cst_269 = arith.constant dense<0.000000e+00> : vector<8x32xf32>
    %337 = tpu.matmul %325, %336, %cst_269 {dimension_numbers = #tpu.dot_dimension_numbers<[1], [0], [0], [1], [0, 0, 1, 1], [], []>} : vector<8x32xf32>, vector<32x32xf32>, vector<8x32xf32> -> vector<8x32xf32>
    %338 = arith.addf %334, %337 : vector<8x32xf32>
    %c2_270 = arith.constant 2 : index
    %c48_271 = arith.constant 48 : index
    %c0_272 = arith.constant 0 : index
    %339 = vector.load %arg12[%c2_270, %c48_271, %c0_272] : memref<4x64x32xf32, #tpu.memory_space<vmem>>, vector<1x8x32xf32>
    %340 = vector.shape_cast %339 : vector<1x8x32xf32> to vector<8x32xf32>
    %c2_273 = arith.constant 2 : index
    %c0_274 = arith.constant 0 : index
    %c0_275 = arith.constant 0 : index
    %341 = vector.load %arg3[%c2_273, %c0_274, %c0_275] : memref<4x32x32xf32, #tpu.memory_space<vmem>>, vector<1x32x32xf32>
    %342 = vector.shape_cast %341 : vector<1x32x32xf32> to vector<32x32xf32>
    %cst_276 = arith.constant dense<0.000000e+00> : vector<8x32xf32>
    %343 = tpu.matmul %325, %342, %cst_276 {dimension_numbers = #tpu.dot_dimension_numbers<[1], [0], [0], [1], [0, 0, 1, 1], [], []>} : vector<8x32xf32>, vector<32x32xf32>, vector<8x32xf32> -> vector<8x32xf32>
    %344 = arith.addf %340, %343 : vector<8x32xf32>
    %c3_277 = arith.constant 3 : index
    %c48_278 = arith.constant 48 : index
    %c0_279 = arith.constant 0 : index
    %345 = vector.load %arg12[%c3_277, %c48_278, %c0_279] : memref<4x64x32xf32, #tpu.memory_space<vmem>>, vector<1x8x32xf32>
    %346 = vector.shape_cast %345 : vector<1x8x32xf32> to vector<8x32xf32>
    %c3_280 = arith.constant 3 : index
    %c0_281 = arith.constant 0 : index
    %c0_282 = arith.constant 0 : index
    %347 = vector.load %arg3[%c3_280, %c0_281, %c0_282] : memref<4x32x32xf32, #tpu.memory_space<vmem>>, vector<1x32x32xf32>
    %348 = vector.shape_cast %347 : vector<1x32x32xf32> to vector<32x32xf32>
    %cst_283 = arith.constant dense<0.000000e+00> : vector<8x32xf32>
    %349 = tpu.matmul %325, %348, %cst_283 {dimension_numbers = #tpu.dot_dimension_numbers<[1], [0], [0], [1], [0, 0, 1, 1], [], []>} : vector<8x32xf32>, vector<32x32xf32>, vector<8x32xf32> -> vector<8x32xf32>
    %350 = arith.addf %346, %349 : vector<8x32xf32>
    %351 = math.tanh %332 : vector<8x32xf32>
    %cst_284 = arith.constant 5.000000e-01 : f32
    %352 = vector.broadcast %cst_284 : f32 to vector<8x32xf32>
    %353 = arith.mulf %352, %351 : vector<8x32xf32>
    %cst_285 = arith.constant 5.000000e-01 : f32
    %354 = vector.broadcast %cst_285 : f32 to vector<8x32xf32>
    %355 = arith.addf %353, %354 : vector<8x32xf32>
    %356 = math.tanh %338 : vector<8x32xf32>
    %cst_286 = arith.constant 5.000000e-01 : f32
    %357 = vector.broadcast %cst_286 : f32 to vector<8x32xf32>
    %358 = arith.mulf %357, %356 : vector<8x32xf32>
    %cst_287 = arith.constant 5.000000e-01 : f32
    %359 = vector.broadcast %cst_287 : f32 to vector<8x32xf32>
    %360 = arith.addf %358, %359 : vector<8x32xf32>
    %361 = math.tanh %344 : vector<8x32xf32>
    %362 = math.tanh %350 : vector<8x32xf32>
    %cst_288 = arith.constant 5.000000e-01 : f32
    %363 = vector.broadcast %cst_288 : f32 to vector<8x32xf32>
    %364 = arith.mulf %363, %362 : vector<8x32xf32>
    %cst_289 = arith.constant 5.000000e-01 : f32
    %365 = vector.broadcast %cst_289 : f32 to vector<8x32xf32>
    %366 = arith.addf %364, %365 : vector<8x32xf32>
    %367 = arith.mulf %360, %323 : vector<8x32xf32>
    %368 = arith.mulf %355, %361 : vector<8x32xf32>
    %369 = arith.addf %367, %368 : vector<8x32xf32>
    %370 = math.tanh %369 : vector<8x32xf32>
    %371 = arith.mulf %366, %370 : vector<8x32xf32>
    %c48_290 = arith.constant 48 : index
    %c0_291 = arith.constant 0 : index
    %372 = vector.load %arg13[%c48_290, %c0_291] : memref<64x32xf32, #tpu.memory_space<vmem>>, vector<8x32xf32>
    tpu.vector_store %arg13[%c48_290, %c0_291], %371 {strides = array<i32>} : memref<64x32xf32, #tpu.memory_space<vmem>>, vector<8x32xf32>,
    %c0_292 = arith.constant 0 : index
    %c56 = arith.constant 56 : index
    %c0_293 = arith.constant 0 : index
    %373 = vector.load %arg12[%c0_292, %c56, %c0_293] : memref<4x64x32xf32, #tpu.memory_space<vmem>>, vector<1x8x32xf32>
    %374 = vector.shape_cast %373 : vector<1x8x32xf32> to vector<8x32xf32>
    %c0_294 = arith.constant 0 : index
    %c0_295 = arith.constant 0 : index
    %c0_296 = arith.constant 0 : index
    %375 = vector.load %arg3[%c0_294, %c0_295, %c0_296] : memref<4x32x32xf32, #tpu.memory_space<vmem>>, vector<1x32x32xf32>
    %376 = vector.shape_cast %375 : vector<1x32x32xf32> to vector<32x32xf32>
    %cst_297 = arith.constant dense<0.000000e+00> : vector<8x32xf32>
    %377 = tpu.matmul %371, %376, %cst_297 {dimension_numbers = #tpu.dot_dimension_numbers<[1], [0], [0], [1], [0, 0, 1, 1], [], []>} : vector<8x32xf32>, vector<32x32xf32>, vector<8x32xf32> -> vector<8x32xf32>
    %378 = arith.addf %374, %377 : vector<8x32xf32>
    %c1_298 = arith.constant 1 : index
    %c56_299 = arith.constant 56 : index
    %c0_300 = arith.constant 0 : index
    %379 = vector.load %arg12[%c1_298, %c56_299, %c0_300] : memref<4x64x32xf32, #tpu.memory_space<vmem>>, vector<1x8x32xf32>
    %380 = vector.shape_cast %379 : vector<1x8x32xf32> to vector<8x32xf32>
    %c1_301 = arith.constant 1 : index
    %c0_302 = arith.constant 0 : index
    %c0_303 = arith.constant 0 : index
    %381 = vector.load %arg3[%c1_301, %c0_302, %c0_303] : memref<4x32x32xf32, #tpu.memory_space<vmem>>, vector<1x32x32xf32>
    %382 = vector.shape_cast %381 : vector<1x32x32xf32> to vector<32x32xf32>
    %cst_304 = arith.constant dense<0.000000e+00> : vector<8x32xf32>
    %383 = tpu.matmul %371, %382, %cst_304 {dimension_numbers = #tpu.dot_dimension_numbers<[1], [0], [0], [1], [0, 0, 1, 1], [], []>} : vector<8x32xf32>, vector<32x32xf32>, vector<8x32xf32> -> vector<8x32xf32>
    %384 = arith.addf %380, %383 : vector<8x32xf32>
    %c2_305 = arith.constant 2 : index
    %c56_306 = arith.constant 56 : index
    %c0_307 = arith.constant 0 : index
    %385 = vector.load %arg12[%c2_305, %c56_306, %c0_307] : memref<4x64x32xf32, #tpu.memory_space<vmem>>, vector<1x8x32xf32>
    %386 = vector.shape_cast %385 : vector<1x8x32xf32> to vector<8x32xf32>
    %c2_308 = arith.constant 2 : index
    %c0_309 = arith.constant 0 : index
    %c0_310 = arith.constant 0 : index
    %387 = vector.load %arg3[%c2_308, %c0_309, %c0_310] : memref<4x32x32xf32, #tpu.memory_space<vmem>>, vector<1x32x32xf32>
    %388 = vector.shape_cast %387 : vector<1x32x32xf32> to vector<32x32xf32>
    %cst_311 = arith.constant dense<0.000000e+00> : vector<8x32xf32>
    %389 = tpu.matmul %371, %388, %cst_311 {dimension_numbers = #tpu.dot_dimension_numbers<[1], [0], [0], [1], [0, 0, 1, 1], [], []>} : vector<8x32xf32>, vector<32x32xf32>, vector<8x32xf32> -> vector<8x32xf32>
    %390 = arith.addf %386, %389 : vector<8x32xf32>
    %c3_312 = arith.constant 3 : index
    %c56_313 = arith.constant 56 : index
    %c0_314 = arith.constant 0 : index
    %391 = vector.load %arg12[%c3_312, %c56_313, %c0_314] : memref<4x64x32xf32, #tpu.memory_space<vmem>>, vector<1x8x32xf32>
    %392 = vector.shape_cast %391 : vector<1x8x32xf32> to vector<8x32xf32>
    %c3_315 = arith.constant 3 : index
    %c0_316 = arith.constant 0 : index
    %c0_317 = arith.constant 0 : index
    %393 = vector.load %arg3[%c3_315, %c0_316, %c0_317] : memref<4x32x32xf32, #tpu.memory_space<vmem>>, vector<1x32x32xf32>
    %394 = vector.shape_cast %393 : vector<1x32x32xf32> to vector<32x32xf32>
    %cst_318 = arith.constant dense<0.000000e+00> : vector<8x32xf32>
    %395 = tpu.matmul %371, %394, %cst_318 {dimension_numbers = #tpu.dot_dimension_numbers<[1], [0], [0], [1], [0, 0, 1, 1], [], []>} : vector<8x32xf32>, vector<32x32xf32>, vector<8x32xf32> -> vector<8x32xf32>
    %396 = arith.addf %392, %395 : vector<8x32xf32>
    %397 = math.tanh %378 : vector<8x32xf32>
    %cst_319 = arith.constant 5.000000e-01 : f32
    %398 = vector.broadcast %cst_319 : f32 to vector<8x32xf32>
    %399 = arith.mulf %398, %397 : vector<8x32xf32>
    %cst_320 = arith.constant 5.000000e-01 : f32
    %400 = vector.broadcast %cst_320 : f32 to vector<8x32xf32>
    %401 = arith.addf %399, %400 : vector<8x32xf32>
    %402 = math.tanh %384 : vector<8x32xf32>
    %cst_321 = arith.constant 5.000000e-01 : f32
    %403 = vector.broadcast %cst_321 : f32 to vector<8x32xf32>
    %404 = arith.mulf %403, %402 : vector<8x32xf32>
    %cst_322 = arith.constant 5.000000e-01 : f32
    %405 = vector.broadcast %cst_322 : f32 to vector<8x32xf32>
    %406 = arith.addf %404, %405 : vector<8x32xf32>
    %407 = math.tanh %390 : vector<8x32xf32>
    %408 = math.tanh %396 : vector<8x32xf32>
    %cst_323 = arith.constant 5.000000e-01 : f32
    %409 = vector.broadcast %cst_323 : f32 to vector<8x32xf32>
    %410 = arith.mulf %409, %408 : vector<8x32xf32>
    %cst_324 = arith.constant 5.000000e-01 : f32
    %411 = vector.broadcast %cst_324 : f32 to vector<8x32xf32>
    %412 = arith.addf %410, %411 : vector<8x32xf32>
    %413 = arith.mulf %406, %369 : vector<8x32xf32>
    %414 = arith.mulf %401, %407 : vector<8x32xf32>
    %415 = arith.addf %413, %414 : vector<8x32xf32>
    %416 = math.tanh %415 : vector<8x32xf32>
    %417 = arith.mulf %412, %416 : vector<8x32xf32>
    %c56_325 = arith.constant 56 : index
    %c0_326 = arith.constant 0 : index
    %418 = vector.load %arg13[%c56_325, %c0_326] : memref<64x32xf32, #tpu.memory_space<vmem>>, vector<8x32xf32>
    tpu.vector_store %arg13[%c56_325, %c0_326], %417 {strides = array<i32>} : memref<64x32xf32, #tpu.memory_space<vmem>>, vector<8x32xf32>,
    %c0_327 = arith.constant 0 : index
    %c0_328 = arith.constant 0 : index
    %419 = vector.load %arg13[%c0_327, %c0_328] : memref<64x32xf32, #tpu.memory_space<vmem>>, vector<64x32xf32>
    %c0_329 = arith.constant 0 : index
    %c0_330 = arith.constant 0 : index
    %420 = vector.load %arg5[%c0_329, %c0_330] : memref<32x128xf32, #tpu.memory_space<vmem>>, vector<32x128xf32>
    %cst_331 = arith.constant dense<0.000000e+00> : vector<64x128xf32>
    %421 = tpu.matmul %419, %420, %cst_331 {dimension_numbers = #tpu.dot_dimension_numbers<[1], [0], [0], [1], [0, 0, 1, 1], [], []>} : vector<64x32xf32>, vector<32x128xf32>, vector<64x128xf32> -> vector<64x128xf32>
    %c0_332 = arith.constant 0 : index
    %c0_333 = arith.constant 0 : index
    %422 = vector.load %arg6[%c0_332, %c0_333] : memref<1x128xf32, #tpu.memory_space<vmem>>, vector<1x128xf32>
    %423 = vector.broadcast %422 : vector<1x128xf32> to vector<64x128xf32>
    %424 = arith.addf %421, %423 : vector<64x128xf32>
    %c0_334 = arith.constant 0 : index
    %c0_335 = arith.constant 0 : index
    %425 = vector.load %arg9[%c0_334, %c0_335] : memref<64x128xf32, #tpu.memory_space<vmem>>, vector<64x128xf32>
    tpu.vector_store %arg9[%c0_334, %c0_335], %424 {strides = array<i32>} : memref<64x128xf32, #tpu.memory_space<vmem>>, vector<64x128xf32>,
    %c0_336 = arith.constant 0 : index
    %c0_337 = arith.constant 0 : index
    %426 = vector.load %arg10[%c0_336, %c0_337] : memref<8x32xf32, #tpu.memory_space<vmem>>, vector<8x32xf32>
    tpu.vector_store %arg10[%c0_336, %c0_337], %417 {strides = array<i32>} : memref<8x32xf32, #tpu.memory_space<vmem>>, vector<8x32xf32>,
    %c0_338 = arith.constant 0 : index
    %c0_339 = arith.constant 0 : index
    %427 = vector.load %arg11[%c0_338, %c0_339] : memref<8x32xf32, #tpu.memory_space<vmem>>, vector<8x32xf32>
    tpu.vector_store %arg11[%c0_338, %c0_339], %415 {strides = array<i32>} : memref<8x32xf32, #tpu.memory_space<vmem>>, vector<8x32xf32>,
    return
  }
}

</mosaic_0001>

<bundles_post_ra>
// kernel: text_rnn_forward.1
= control target key start
LH: loop header
LB: loop body
LE: loop exit
PB: predicated region body
PF: predicated region fallthrough
CT: control target
= control target key end

     0   :  { %v1802_v0 = vmov 0   ;;  %v43_v17 = vlaneseq  ;;  %vm93_vm0 = vcmask 523264   ;;  %v1803_v20 = vmov 0.0   ;;  %s2428_s0 = inlined_call_operand.vmem [shape: s32[64,1], index: 0, kind: input, shape index: {}]   ;;  %s2429_s1 = inlined_call_operand.vmem [shape: f32[64,32], index: 1, kind: input, shape index: {}]   ;;  %s2430_s2 = inlined_call_operand.vmem [shape: f32[4,32,32], index: 2, kind: input, shape index: {}]   ;;  %s2431_s4 = inlined_call_operand.vmem [shape: f32[4,1,32], index: 4, kind: input, shape index: {}]   ;;  %s2432_s3 = inlined_call_operand.vmem [shape: f32[4,32,32], index: 3, kind: input, shape index: {}]   ;;  %s2433_s7 = inlined_call_operand.vmem [shape: f32[8,32], index: 7, kind: input, shape index: {}]   ;;  %s2434_s8 = inlined_call_operand.vmem [shape: f32[8,32], index: 8, kind: input, shape index: {}]   ;;  %s2435_s5 = inlined_call_operand.vmem [shape: f32[32,128], index: 5, kind: input, shape index: {}]   ;;  %s2436_s6 = inlined_call_operand.vmem [shape: f32[1,128], index: 6, kind: input, shape index: {}]   ;;  %s2437_s9 = inlined_call_operand.vmem [shape: f32[64,128], index: 9, kind: output, shape index: {0}]   ;;  %s2438_s11 = inlined_call_operand.vmem [shape: f32[8,32], index: 11, kind: output, shape index: {2}]   ;;  %s2439_s10 = inlined_call_operand.vmem [shape: f32[8,32], index: 10, kind: output, shape index: {1}]  }
   0x1   :  { %1715 = vset.pattern.permute.xlu1 %v1802_v0  ;;  %1714 = vset.pattern.permute.xlu0 %v1802_v0  ;;  %v37_v1 = vld [vmem:[%s2428_s0 + $0x10] sm:$0xff]  ;;  %v35_v2 = vld [vmem:[%s2428_s0] sm:$0xff]  ;;  %v92_v4 = vld [vmem:[%s2429_s1 + $0x38] sm:$0xff]  ;;  %vm167_vm9 = vcmask 261120  }
   0x2   :  { %52 = vperm.xlu1 %1715, %v37_v1   ;;  %46 = vperm.xlu0 %1714, %v35_v2   ;;  %v39_v3 = vld [vmem:[%s2428_s0 + $0x20] sm:$0xff]  ;;  %v91_v5 = vld [vmem:[%s2429_s1 + $0x30] sm:$0xff]  ;;  %v90_v6 = vld [vmem:[%s2429_s1 + $0x28] sm:$0xff]  ;;  %v44_v18 = vand.u32 127, %v43_v17 }
   0x3   :  { %1716 = vset.pattern.permute.xlu2 %v1802_v0  ;;  %126 = vmatpush.msra.mxu0 %v92_v4  ;;  %v38_v7 = vld [vmem:[%s2428_s0 + $0x18] sm:$0xff]  ;;  %v36_v8 = vld [vmem:[%s2428_s0 + $0x8] sm:$0xff]  ;;  %v89_v9 = vld [vmem:[%s2429_s1 + $0x20] sm:$0xff] }
   0x4   :  { %58 = vperm.xlu2 %1716, %v39_v3   ;;  %v40_v10 = vld [vmem:[%s2428_s0 + $0x28] sm:$0xff]  ;;  %v88_v11 = vld [vmem:[%s2429_s1 + $0x18] sm:$0xff]  ;;  %v87_v12 = vld [vmem:[%s2429_s1 + $0x10] sm:$0xff] }
   0x5   :  { %127 = vmatpush.msra.mxu0 %v91_v5  ;;  %v86_v13 = vld [vmem:[%s2429_s1 + $0x8] sm:$0xff]  ;;  %v42_v14 = vld [vmem:[%s2428_s0 + $0x38] sm:$0xff]  ;;  %v41_v15 = vld [vmem:[%s2428_s0 + $0x30] sm:$0xff] }
   0x6   :  { %v85_v16 = vld [vmem:[%s2429_s1] sm:$0xff]  ;;  %v162_v29 = vld [vmem:[%s2430_s2 + $0x18] sm:$0xff]  ;;  %v161_v30 = vld [vmem:[%s2430_s2 + $0x10] sm:$0xff] }
   0x7   :  { %128 = vmatpush.msra.mxu0 %v90_v6  ;;  %204 = vmatpush.msra.mxu1 %v162_v29  ;;  %v160_v31 = vld [vmem:[%s2430_s2 + $0x8] sm:$0xff]  ;;  %v159_v39 = vld [vmem:[%s2430_s2] sm:$0xff]  ;;  %v1558_v40 = vld [vmem:[%s2430_s2 + $0x78] sm:$0xff] }
   0x8   :  { %1704 = vmatpush.msra.mxu2 %v162_v29  ;;  %1705 = vmatpush.msra.mxu3 %v162_v29  ;;  %v1557_v41 = vld [vmem:[%s2430_s2 + $0x70] sm:$0xff]  ;;  %v1556_v42 = vld [vmem:[%s2430_s2 + $0x68] sm:$0xff]  ;;  %v1555_v43 = vld [vmem:[%s2430_s2 + $0x60] sm:$0xff] }
   0x9   :  { %129 = vmatpush.msra.mxu0 %v89_v9  ;;  %205 = vmatpush.msra.mxu1 %v161_v30  ;;  %v1532_v46 = vld [vmem:[%s2430_s2 + $0x38] sm:$0xff]  ;;  %v1531_v47 = vld [vmem:[%s2430_s2 + $0x30] sm:$0xff]  ;;  %v1530_v48 = vld [vmem:[%s2430_s2 + $0x28] sm:$0xff] }
   0xa   :  { %55 = vperm.xlu1 %1715, %v38_v7   ;;  %49 = vperm.xlu0 %1714, %v36_v8   ;;  %v1529_v49 = vld [vmem:[%s2430_s2 + $0x20] sm:$0xff]  ;;  %v1545_v51 = vld [vmem:[%s2430_s2 + $0x58] sm:$0xff]  ;;  %v1544_v52 = vld [vmem:[%s2430_s2 + $0x50] sm:$0xff] }
   0xb   :  { %130 = vmatpush.msra.mxu0 %v88_v11  ;;  %1706 = vmatpush.msra.mxu2 %v161_v30  ;;  %v1543_v54 = vld [vmem:[%s2430_s2 + $0x48] sm:$0xff]  ;;  %v1542_v55 = vld [vmem:[%s2430_s2 + $0x40] sm:$0xff]  ;;  %v1991_v57 = vld [vmem:[%s2432_s3 + $0x18] sm:$0xff] }
   0xc   :  { %61 = vperm.xlu2 %1716, %v40_v10   ;;  %1707 = vmatpush.msra.mxu3 %v161_v30  ;;  %v2003_v59 = vld [vmem:[%s2432_s3 + $0x58] sm:$0xff]  ;;  %v2008_v60 = vld [vmem:[%s2432_s3 + $0x50] sm:$0xff]  ;;  %v2014_v61 = vld [vmem:[%s2432_s3 + $0x48] sm:$0xff] }
   0xd   :  { %131 = vmatpush.msra.mxu0 %v87_v12  ;;  %206 = vmatpush.msra.mxu1 %v160_v31  ;;  %v2020_v62 = vld [vmem:[%s2432_s3 + $0x38] sm:$0xff]  ;;  %v2026_v0 = vld [vmem:[%s2432_s3 + $0x40] sm:$0xff]  ;;  %v2041_v2 = vld [vmem:[%s2432_s3 + $0x10] sm:$0xff] }
   0xe   :  { %1708 = vmatpush.msra.mxu2 %v160_v31  ;;  %1709 = vmatpush.msra.mxu3 %v160_v31  ;;  %v2033_v1 = vld [vmem:[%s2433_s7] sm:$0xff]  ;;  %v2046_v3 = vld [vmem:[%s2432_s3 + $0x30] sm:$0xff]  ;;  %v2066_v5 = vld [vmem:[%s2432_s3 + $0x8] sm:$0xff] }
   0xf   :  { %132 = vmatpush.msra.mxu0 %v86_v13  ;;  %207 = vmatpush.msra.mxu1 %v159_v39  ;;  %v2071_v6 = vld [vmem:[%s2432_s3 + $0x28] sm:$0xff]  ;;  %v2085_v7 = vld [vmem:[%s2432_s3] sm:$0xff]  ;;  %v2101_v9 = vld [vmem:[%s2432_s3 + $0x78] sm:$0xff] }
  0x10   :  { %1710 = vmatpush.msra.mxu2 %v159_v39  ;;  %1711 = vmatpush.msra.mxu3 %v159_v39  ;;  %v2096_v8 = vld [vmem:[%s2432_s3 + $0x20] sm:$0xff]  ;;  %v2108_v10 = vld [vmem:[%s2432_s3 + $0x70] sm:$0xff]  ;;  %v2115_v11 = vld [vmem:[%s2432_s3 + $0x68] sm:$0xff] }
  0x11   :  { %133 = vmatpush.msra.mxu0 %v85_v16  ;;  %383 = vmatpush.msrb.mxu1 %v1558_v40  ;;  %v2125_v12 = vld [vmem:[%s2432_s3 + $0x60] sm:$0xff] }
  0x12   :  { %67 = vperm.xlu1 %1715, %v42_v14   ;;  %64 = vperm.xlu0 %1714, %v41_v15   ;;  %v1717_v13 = vld [vmem:[%s2431_s4] ss:$0 sm:$0xff] }
  0x13   :  { %384 = vmatpush.msrb.mxu1 %v1557_v41  ;;  %263 = vmatpush.msrb.mxu2 %v1532_v46 }
  0x14   :  { %323 = vmatpush.msrb.mxu3 %v1545_v51  ;;  %497 = vmatpush.msrb.mxu0 %v2003_v59 }
  0x15   :  { %385 = vmatpush.msrb.mxu1 %v1556_v42  ;;  %264 = vmatpush.msrb.mxu2 %v1531_v47 }
  0x16   :  { %324 = vmatpush.msrb.mxu3 %v1544_v52  ;;  %498 = vmatpush.msrb.mxu0 %v2008_v60 }
  0x17   :  { %386 = vmatpush.msrb.mxu1 %v1555_v43  ;;  %265 = vmatpush.msrb.mxu2 %v1530_v48  ;;  %v1720_v48 = vld [vmem:[%s2431_s4 + $0x2] ss:$0 sm:$0xff] }
  0x18   :  { %325 = vmatpush.msrb.mxu3 %v1543_v54  ;;  %499 = vmatpush.msrb.mxu0 %v2014_v61 }
  0x19   :  { %266 = vmatpush.msrb.mxu2 %v1529_v49 }
  0x1a   :  { %326 = vmatpush.msrb.mxu3 %v1542_v55  ;;  %500 = vmatpush.msrb.mxu0 %v2026_v0 }
  0x5e   :  { %v59_v28 = vpop.permute.xlu2 %58 }
  0x5f   :  { %vm73_vm5 = vcmp.eq.s32.totalorder %v59_v28, %v44_v18 }
  0x60   :  { %v81_v32 = vsel %vm73_vm5, 1.0, %v1803_v20 }
  0x66   :  { %v62_v33 = vpop.permute.xlu2 %61 }
  0x67   :  { %vm74_vm6 = vcmp.eq.s32.totalorder %v62_v33, %v44_v18 }
  0x68   :  { %v82_v34 = vsel %vm74_vm6, 1.0, %v1803_v20 }
  0x74   :  { %v47_v19 = vpop.permute.xlu0 %46  ;;  %v53_v24 = vpop.permute.xlu1 %52 }
  0x75   :  { %vm69_vm1 = vcmp.eq.s32.totalorder %v47_v19, %v44_v18  ;;  %vm71_vm3 = vcmp.eq.s32.totalorder %v53_v24, %v44_v18 }
  0x76   :  { %v77_v21 = vsel %vm69_vm1, 1.0, %v1803_v20  ;;  %v79_v25 = vsel %vm71_vm3, 1.0, %v1803_v20 }
  0x77   :  { %1513 = vmatmul.msk.f32.vlgmr.msra.gmra.mxu0 %vm93_vm0, %v77_v21 }
  0x78   :  { %595 = vmatpush.msra.mxu0 %v2020_v62 }
  0x7a   :  { %596 = vmatpush.msra.mxu0 %v2046_v3 }
  0x7c   :  { %v50_v22 = vpop.permute.xlu0 %49  ;;  %v56_v26 = vpop.permute.xlu1 %55  ;;  %597 = vmatpush.msra.mxu0 %v2071_v6 }
  0x7d   :  { %vm70_vm2 = vcmp.eq.s32.totalorder %v50_v22, %v44_v18  ;;  %vm72_vm4 = vcmp.eq.s32.totalorder %v56_v26, %v44_v18 }
  0x7e   :  { %v78_v23 = vsel %vm70_vm2, 1.0, %v1803_v20  ;;  %v80_v27 = vsel %vm72_vm4, 1.0, %v1803_v20  ;;  %598 = vmatpush.msra.mxu0 %v2096_v8 }
  0x7f   :  { %1514 = vmatmul.msk.f32.gmra.mxu0 %vm93_vm0, %v78_v23 }
  0x84   :  { %v65_v35 = vpop.permute.xlu0 %64  ;;  %v68_v37 = vpop.permute.xlu1 %67 }
  0x85   :  { %vm75_vm7 = vcmp.eq.s32.totalorder %v65_v35, %v44_v18  ;;  %vm76_vm8 = vcmp.eq.s32.totalorder %v68_v37, %v44_v18  ;;  %v1719_v35 = vld [vmem:[%s2431_s4 + $0x1] ss:$0 sm:$0xff] }
  0x86   :  { %v83_v36 = vsel %vm75_vm7, 1.0, %v1803_v20  ;;  %v84_v38 = vsel %vm76_vm8, 1.0, %v1803_v20  ;;  %v1718_v20 = vld [vmem:[%s2431_s4 + $0x3] ss:$0 sm:$0xff] }
  0x87   :  { %1515 = vmatmul.msk.f32.gmra.mxu0 %vm93_vm0, %v79_v25 }
  0x8f   :  { %1516 = vmatmul.msk.f32.gmra.mxu0 %vm93_vm0, %v80_v27 }
  0x97   :  { %1517 = vmatmul.msk.f32.gmra.mxu0 %vm93_vm0, %v81_v32 }
  0x9f   :  { %1518 = vmatmul.msk.f32.gmra.mxu0 %vm93_vm0, %v82_v34 }
  0xa7   :  { %1519 = vmatmul.msk.f32.gmra.mxu0 %vm93_vm0, %v83_v36 }
  0xaf   :  { %1520 = vmatmul.msk.f32.gmra.mxu0 %vm93_vm0, %v84_v38 }
  0xb7   :  { %1578 = vmatmul.msk.f32.vlgmr.msrb.gmra.mxu0 %vm167_vm9, %v2033_v1 }
  0xb8   :  { %692 = vmatpush.msrb.mxu0 %v1991_v57 }
  0xba   :  { %693 = vmatpush.msrb.mxu0 %v2041_v2 }
  0xbc   :  { %694 = vmatpush.msrb.mxu0 %v2066_v5 }
  0xbe   :  { %695 = vmatpush.msrb.mxu0 %v2085_v7 }
  0xf4   :  { %v135_v44 = vpop.f32.mrf.mxu0 }
  0xf5   :  { %1521 = vmatmul.msk.f32.vlgmr.msra.gmra.mxu1 %vm167_vm9, %v135_v44 }
  0xfc   :  { %v1945_v45 = vpop.f32.mrf.mxu0 }
  0xfd   :  { %1522 = vmatmul.msk.f32.gmra.mxu1 %vm167_vm9, %v1945_v45 }
 0x104   :  { %v1961_v50 = vpop.f32.mrf.mxu0 }
 0x105   :  { %1523 = vmatmul.msk.f32.gmra.mxu1 %vm167_vm9, %v1961_v50 }
 0x10c   :  { %v1971_v53 = vpop.f32.mrf.mxu0 }
 0x10d   :  { %1524 = vmatmul.msk.f32.vlgmr.msra.gmra.mxu2 %vm167_vm9, %v1971_v53  ;;  %1560 = vmatmul.msk.f32.vlgmr.msrb.gmra.mxu1 %vm167_vm9, %v135_v44 }
 0x10e   :  { %443 = vmatpush.msra.mxu2 %v1991_v57 }
 0x110   :  { %444 = vmatpush.msra.mxu2 %v2041_v2 }
 0x112   :  { %445 = vmatpush.msra.mxu2 %v2066_v5 }
 0x114   :  { %v1982_v56 = vpop.f32.mrf.mxu0  ;;  %446 = vmatpush.msra.mxu2 %v2085_v7 }
 0x115   :  { %1525 = vmatmul.msk.f32.gmra.mxu2 %vm167_vm9, %v1982_v56  ;;  %1561 = vmatmul.msk.f32.gmra.mxu1 %vm167_vm9, %v1945_v45 }
 0x11c   :  { %v1994_v58 = vpop.f32.mrf.mxu0 }
 0x11d   :  { %1526 = vmatmul.msk.f32.gmra.mxu2 %vm167_vm9, %v1994_v58  ;;  %1562 = vmatmul.msk.f32.gmra.mxu1 %vm167_vm9, %v1961_v50 }
 0x124   :  { %v153_v63 = vpop.f32.mrf.mxu0 }
 0x125   :  { %1527 = vmatmul.msk.f32.vlgmr.msra.gmra.mxu3 %vm167_vm9, %v153_v63  ;;  %1534 = vmatmul.msk.f32.vlgmr.msrb.gmra.mxu2 %vm167_vm9, %v135_v44 }
 0x126   :  { %1563 = vmatmul.msk.f32.gmra.mxu1 %vm167_vm9, %v1971_v53  ;;  %470 = vmatpush.msra.mxu3 %v2020_v62 }
 0x127   :  { %524 = vmatpush.msrb.mxu2 %v2101_v9 }
 0x128   :  { %471 = vmatpush.msra.mxu3 %v2046_v3 }
 0x129   :  { %525 = vmatpush.msrb.mxu2 %v2108_v10 }
 0x12a   :  { %472 = vmatpush.msra.mxu3 %v2071_v6 }
 0x12b   :  { %526 = vmatpush.msrb.mxu2 %v2115_v11 }
 0x12c   :  { %v156_v4 = vpop.f32.mrf.mxu0  ;;  %473 = vmatpush.msra.mxu3 %v2096_v8 }
 0x12d   :  { %1528 = vmatmul.msk.f32.gmra.mxu3 %vm167_vm9, %v156_v4  ;;  %1535 = vmatmul.msk.f32.gmra.mxu2 %vm167_vm9, %v1945_v45 }
 0x12e   :  { %1564 = vmatmul.msk.f32.gmra.mxu1 %vm167_vm9, %v1982_v56  ;;  %527 = vmatpush.msrb.mxu2 %v2125_v12 }
 0x135   :  { %1536 = vmatmul.msk.f32.gmra.mxu2 %vm167_vm9, %v1961_v50  ;;  %1547 = vmatmul.msk.f32.vlgmr.msrb.gmra.mxu3 %vm167_vm9, %v135_v44 }
 0x136   :  { %1565 = vmatmul.msk.f32.gmra.mxu1 %vm167_vm9, %v1994_v58  ;;  %569 = vmatpush.msrb.mxu3 %v1991_v57 }
 0x138   :  { %570 = vmatpush.msrb.mxu3 %v2041_v2 }
 0x13a   :  { %571 = vmatpush.msrb.mxu3 %v2066_v5 }
 0x13c   :  { %572 = vmatpush.msrb.mxu3 %v2085_v7 }
 0x13d   :  { %1537 = vmatmul.msk.f32.gmra.mxu2 %vm167_vm9, %v1971_v53  ;;  %1548 = vmatmul.msk.f32.gmra.mxu3 %vm167_vm9, %v1945_v45 }
 0x13e   :  { %1566 = vmatmul.msk.f32.gmra.mxu1 %vm167_vm9, %v153_v63 }
 0x145   :  { %1538 = vmatmul.msk.f32.gmra.mxu2 %vm167_vm9, %v1982_v56  ;;  %1549 = vmatmul.msk.f32.gmra.mxu3 %vm167_vm9, %v1961_v50 }
 0x146   :  { %1567 = vmatmul.msk.f32.gmra.mxu1 %vm167_vm9, %v156_v4 }
 0x14d   :  { %1539 = vmatmul.msk.f32.gmra.mxu2 %vm167_vm9, %v1994_v58  ;;  %1550 = vmatmul.msk.f32.gmra.mxu3 %vm167_vm9, %v1971_v53 }
 0x155   :  { %1540 = vmatmul.msk.f32.gmra.mxu2 %vm167_vm9, %v153_v63  ;;  %1551 = vmatmul.msk.f32.gmra.mxu3 %vm167_vm9, %v1982_v56 }
 0x15d   :  { %1541 = vmatmul.msk.f32.gmra.mxu2 %vm167_vm9, %v156_v4  ;;  %1552 = vmatmul.msk.f32.gmra.mxu3 %vm167_vm9, %v1994_v58 }
 0x165   :  { %1553 = vmatmul.msk.f32.gmra.mxu3 %vm167_vm9, %v153_v63  ;;  %1568 = vmatmul.msk.f32.vlgmr.msra.gmra.mxu2 %vm167_vm9, %v2033_v1 }
 0x166   :  { %621 = vmatpush.msra.mxu2 %v2003_v59 }
 0x168   :  { %622 = vmatpush.msra.mxu2 %v2008_v60 }
 0x16a   :  { %623 = vmatpush.msra.mxu2 %v2014_v61 }
 0x16c   :  { %624 = vmatpush.msra.mxu2 %v2026_v0 }
 0x16d   :  { %1554 = vmatmul.msk.f32.gmra.mxu3 %vm167_vm9, %v156_v4  ;;  %1583 = vmatmul.msk.f32.vlgmr.msrb.gmra.mxu2 %vm167_vm9, %v2033_v1 }
 0x16e   :  { %718 = vmatpush.msrb.mxu2 %v2020_v62 }
 0x170   :  { %719 = vmatpush.msrb.mxu2 %v2046_v3 }
 0x172   :  { %v209_v14 = vpop.f32.mrf.mxu1  ;;  %720 = vmatpush.msrb.mxu2 %v2071_v6 }
 0x173   :  { %v210_v15 = vadd.f32 %v1717_v13, %v209_v14 }
 0x174   :  { %721 = vmatpush.msrb.mxu2 %v2096_v8 }
 0x175   :  { %233 = vst.msk [vmem:[#allocation2] sm:$0xff] %vm167_vm9, %v210_v15  ;;  %1573 = vmatmul.msk.f32.vlgmr.msra.gmra.mxu3 %vm167_vm9, %v2033_v1 }
 0x176   :  { %647 = vmatpush.msra.mxu3 %v2101_v9 }
 0x178   :  { %648 = vmatpush.msra.mxu3 %v2108_v10 }
 0x17a   :  { %v212_v16 = vpop.f32.mrf.mxu1  ;;  %649 = vmatpush.msra.mxu3 %v2115_v11 }
 0x17b   :  { %v213_v17 = vadd.f32 %v1717_v13, %v212_v16 }
 0x17c   :  { %650 = vmatpush.msra.mxu3 %v2125_v12 }
 0x17d   :  { %234 = vst.msk [vmem:[#allocation2 + $0x8] sm:$0xff] %vm167_vm9, %v213_v17 }
 0x182   :  { %v215_v18 = vpop.f32.mrf.mxu1 }
 0x183   :  { %v216_v19 = vadd.f32 %v1717_v13, %v215_v18 }
 0x185   :  { %235 = vst.msk [vmem:[#allocation2 + $0x10] sm:$0xff] %vm167_vm9, %v216_v19 }
 0x18a   :  { %v388_v21 = vpop.f32.mrf.mxu1 }
 0x18b   :  { %v389_v22 = vadd.f32 %v1718_v20, %v388_v21 }
 0x18d   :  { %413 = vst.msk [vmem:[#allocation2 + $0xc0] sm:$0xff] %vm167_vm9, %v389_v22 }
 0x190   :  { %v218_v23 = vpop.f32.mrf.mxu2 }
 0x191   :  { %v219_v24 = vadd.f32 %v1717_v13, %v218_v23 }
 0x192   :  { %v391_v25 = vpop.f32.mrf.mxu1 }
 0x193   :  { %236 = vst.msk [vmem:[#allocation2 + $0x18] sm:$0xff] %vm167_vm9, %v219_v24  ;;  %v392_v26 = vadd.f32 %v1718_v20, %v391_v25 }
 0x195   :  { %414 = vst.msk [vmem:[#allocation2 + $0xc8] sm:$0xff] %vm167_vm9, %v392_v26 }
 0x198   :  { %v221_v27 = vpop.f32.mrf.mxu2 }
 0x199   :  { %v222_v28 = vadd.f32 %v1717_v13, %v221_v27 }
 0x19a   :  { %v394_v29 = vpop.f32.mrf.mxu1 }
 0x19b   :  { %237 = vst.msk [vmem:[#allocation2 + $0x20] sm:$0xff] %vm167_vm9, %v222_v28  ;;  %v395_v30 = vadd.f32 %v1718_v20, %v394_v29 }
 0x19d   :  { %415 = vst.msk [vmem:[#allocation2 + $0xd0] sm:$0xff] %vm167_vm9, %v395_v30 }
 0x1a0   :  { %v224_v31 = vpop.f32.mrf.mxu2 }
 0x1a1   :  { %v225_v32 = vadd.f32 %v1717_v13, %v224_v31 }
 0x1a3   :  { %238 = vst.msk [vmem:[#allocation2 + $0x28] sm:$0xff] %vm167_vm9, %v225_v32  ;;  %v397_v33 = vpop.f32.mrf.mxu1  ;;  %v423_v32 = vld [vmem:[#allocation2] sm:$0xff] }
 0x1a4   :  { %v398_v34 = vadd.f32 %v1718_v20, %v397_v33 }
 0x1a6   :  { %416 = vst.msk [vmem:[#allocation2 + $0xd8] sm:$0xff] %vm167_vm9, %v398_v34 }
 0x1a8   :  { %v227_v36 = vpop.f32.mrf.mxu3  ;;  %v268_v37 = vpop.f32.mrf.mxu2 }
 0x1a9   :  { %v228_v38 = vadd.f32 %v1717_v13, %v227_v36  ;;  %v269_v39 = vadd.f32 %v1719_v35, %v268_v37 }
 0x1ab   :  { %239 = vst.msk [vmem:[#allocation2 + $0x30] sm:$0xff] %vm167_vm9, %v228_v38  ;;  %v400_v40 = vpop.f32.mrf.mxu1  ;;  %v502_v38 = vpop.f32.mrf.mxu0 }
 0x1ac   :  { %293 = vst.msk [vmem:[#allocation2 + $0x40] sm:$0xff] %vm167_vm9, %v269_v39  ;;  %v401_v41 = vadd.f32 %v1718_v20, %v400_v40 }
 0x1ae   :  { %417 = vst.msk [vmem:[#allocation2 + $0xe0] sm:$0xff] %vm167_vm9, %v401_v41 }
 0x1b0   :  { %v230_v42 = vpop.f32.mrf.mxu3  ;;  %v271_v43 = vpop.f32.mrf.mxu2 }
 0x1b1   :  { %v231_v44 = vadd.f32 %v1717_v13, %v230_v42  ;;  %v272_v45 = vadd.f32 %v1719_v35, %v271_v43 }
 0x1b3   :  { %240 = vst.msk [vmem:[#allocation2 + $0x38] sm:$0xff] %vm167_vm9, %v231_v44  ;;  %v403_v46 = vpop.f32.mrf.mxu1  ;;  %v506_v44 = vld [vmem:[#allocation2 + $0xc0] sm:$0xff] }
 0x1b4   :  { %294 = vst.msk [vmem:[#allocation2 + $0x48] sm:$0xff] %vm167_vm9, %v272_v45  ;;  %v404_v47 = vadd.f32 %v1718_v20, %v403_v46 }
 0x1b6   :  { %418 = vst.msk [vmem:[#allocation2 + $0xe8] sm:$0xff] %vm167_vm9, %v404_v47 }
 0x1b8   :  { %v274_v49 = vpop.f32.mrf.mxu2  ;;  %v328_v50 = vpop.f32.mrf.mxu3 }
 0x1b9   :  { %v275_v51 = vadd.f32 %v1719_v35, %v274_v49  ;;  %v329_v52 = vadd.f32 %v1720_v48, %v328_v50  ;;  %v422_v50 = vld [vmem:[%s2434_s8] sm:$0xff] }
 0x1bb   :  { %295 = vst.msk [vmem:[#allocation2 + $0x50] sm:$0xff] %vm167_vm9, %v275_v51  ;;  %v406_v53 = vpop.f32.mrf.mxu1 }
 0x1bc   :  { %353 = vst.msk [vmem:[#allocation2 + $0x80] sm:$0xff] %vm167_vm9, %v329_v52  ;;  %v407_v54 = vadd.f32 %v1718_v20, %v406_v53 }
 0x1be   :  { %419 = vst.msk [vmem:[#allocation2 + $0xf0] sm:$0xff] %vm167_vm9, %v407_v54 }
 0x1c0   :  { %v277_v55 = vpop.f32.mrf.mxu2  ;;  %v331_v56 = vpop.f32.mrf.mxu3 }
 0x1c1   :  { %v278_v58 = vadd.f32 %v1719_v35, %v277_v55  ;;  %v332_v63 = vadd.f32 %v1720_v48, %v331_v56 }
 0x1c3   :  { %296 = vst.msk [vmem:[#allocation2 + $0x58] sm:$0xff] %vm167_vm9, %v278_v58  ;;  %v409_v1 = vpop.f32.mrf.mxu1  ;;  %v479_v37 = vld [vmem:[#allocation2 + $0x80] sm:$0xff] }
 0x1c4   :  { %354 = vst.msk [vmem:[#allocation2 + $0x88] sm:$0xff] %vm167_vm9, %v332_v63  ;;  %v410_v4 = vadd.f32 %v1718_v20, %v409_v1  ;;  %v505_v42 = vadd.f32 %v502_v38, %v479_v37 }
 0x1c6   :  { %420 = vst.msk [vmem:[#allocation2 + $0xf8] sm:$0xff] %vm167_vm9, %v410_v4 }
 0x1c8   :  { %v280_v13 = vpop.f32.mrf.mxu2  ;;  %v334_v14 = vpop.f32.mrf.mxu3 }
 0x1c9   :  { %v281_v15 = vadd.f32 %v1719_v35, %v280_v13  ;;  %v335_v16 = vadd.f32 %v1720_v48, %v334_v14  ;;  %v578_v13 = vld [vmem:[#allocation2 + $0x48] sm:$0xff] }
 0x1cb   :  { %297 = vst.msk [vmem:[#allocation2 + $0x60] sm:$0xff] %vm167_vm9, %v281_v15 }
 0x1cc   :  { %355 = vst.msk [vmem:[#allocation2 + $0x90] sm:$0xff] %vm167_vm9, %v335_v16  ;;  %v549_v16 = vld [vmem:[#allocation2 + $0x8] sm:$0xff] }
 0x1d0   :  { %v283_v17 = vpop.f32.mrf.mxu2  ;;  %v337_v18 = vpop.f32.mrf.mxu3 }
 0x1d1   :  { %v284_v19 = vadd.f32 %v1719_v35, %v283_v17  ;;  %v338_v21 = vadd.f32 %v1720_v48, %v337_v18 }
 0x1d3   :  { %298 = vst.msk [vmem:[#allocation2 + $0x68] sm:$0xff] %vm167_vm9, %v284_v19 }
 0x1d4   :  { %356 = vst.msk [vmem:[#allocation2 + $0x98] sm:$0xff] %vm167_vm9, %v338_v21  ;;  %v604_v21 = vld [vmem:[#allocation2 + $0x88] sm:$0xff] }
 0x1d8   :  { %v286_v22 = vpop.f32.mrf.mxu2  ;;  %v340_v20 = vpop.f32.mrf.mxu3 }
 0x1d9   :  { %v287_v23 = vadd.f32 %v1719_v35, %v286_v22  ;;  %v341_v24 = vadd.f32 %v1720_v48, %v340_v20 }
 0x1db   :  { %299 = vst.msk [vmem:[#allocation2 + $0x70] sm:$0xff] %vm167_vm9, %v287_v23 }
 0x1dc   :  { %357 = vst.msk [vmem:[#allocation2 + $0xa0] sm:$0xff] %vm167_vm9, %v341_v24  ;;  %v630_v24 = vld [vmem:[#allocation2 + $0xc8] sm:$0xff] }
 0x1e0   :  { %v289_v25 = vpop.f32.mrf.mxu2  ;;  %v343_v26 = vpop.f32.mrf.mxu3 }
 0x1e1   :  { %v290_v27 = vadd.f32 %v1719_v35, %v289_v25  ;;  %v344_v28 = vadd.f32 %v1720_v48, %v343_v26  ;;  %v452_v35 = vld [vmem:[#allocation2 + $0x40] sm:$0xff] }
 0x1e3   :  { %300 = vst.msk [vmem:[#allocation2 + $0x78] sm:$0xff] %vm167_vm9, %v290_v27 }
 0x1e4   :  { %358 = vst.msk [vmem:[#allocation2 + $0xa8] sm:$0xff] %vm167_vm9, %v344_v28 }
 0x1e8   :  { %v346_v29 = vpop.f32.mrf.mxu3  ;;  %v448_v31 = vpop.f32.mrf.mxu2 }
 0x1e9   :  { %v347_v30 = vadd.f32 %v1720_v48, %v346_v29  ;;  %v451_v34 = vadd.f32 %v448_v31, %v423_v32 }
 0x1eb   :  { %359 = vst.msk [vmem:[#allocation2 + $0xb0] sm:$0xff] %vm167_vm9, %v347_v30  ;;  %1722 = vtanh.f32 %v451_v34 }
 0x1f0   :  { %v349_v33 = vpop.f32.mrf.mxu3  ;;  %v529_v43 = vpop.f32.mrf.mxu2 }
 0x1f1   :  { %v350_v36 = vadd.f32 %v1720_v48, %v349_v33  ;;  %v1723_v41 = vpop.eup %1722  ;;  %v532_v46 = vadd.f32 %v529_v43, %v506_v44  ;;  %v701_v43 = vld [vmem:[#allocation2 + $0x50] sm:$0xff] }
 0x1f2   :  { %v534_v45 = vmul.f32 0.5, %v1723_v41 }
 0x1f3   :  { %360 = vst.msk [vmem:[#allocation2 + $0xb8] sm:$0xff] %vm167_vm9, %v350_v36 }
 0x1f4   :  { %v535_v49 = vadd.f32 0.5, %v534_v45 }
 0x1f8   :  { %v475_v39 = vpop.f32.mrf.mxu3 }
 0x1f9   :  { %v478_v40 = vadd.f32 %v475_v39, %v452_v35 }
 0x1fb   :  { %1724 = vtanh.f32 %v478_v40  ;;  %v672_v40 = vld [vmem:[#allocation2 + $0x10] sm:$0xff] }
 0x1fc   :  { %1726 = vtanh.f32 %v505_v42 }
 0x1fd   :  { %1728 = vtanh.f32 %v532_v46  ;;  %v727_v46 = vld [vmem:[#allocation2 + $0x90] sm:$0xff] }
 0x201   :  { %v1725_v47 = vpop.eup %1724 }
 0x202   :  { %v537_v48 = vmul.f32 0.5, %v1725_v47  ;;  %v1727_v52 = vpop.eup %1726 }
 0x203   :  { %v544_v53 = vmul.f32 %v1727_v52, %v535_v49  ;;  %v1729_v55 = vpop.eup %1728 }
 0x204   :  { %v538_v51 = vadd.f32 0.5, %v537_v48  ;;  %v541_v58 = vmul.f32 0.5, %v1729_v55 }
 0x206   :  { %v543_v54 = vmul.f32 %v538_v51, %v422_v50  ;;  %v542_v63 = vadd.f32 0.5, %v541_v58  ;;  %v753_v51 = vld [vmem:[#allocation2 + $0xd0] sm:$0xff] }
 0x208   :  { %v545_v56 = vadd.f32 %v544_v53, %v543_v54 }
 0x20a   :  { %1730 = vtanh.f32 %v545_v56 }
 0x210   :  { %v1731_v1 = vpop.eup %1730 }
 0x211   :  { %v547_v4 = vmul.f32 %v1731_v1, %v542_v63 }
 0x213   :  { %548 = vst.msk [vmem:[#allocation3] sm:$0xff] %vm167_vm9, %v547_v4  ;;  %1584 = vmatmul.msk.f32.vlgmr.msrb.gmra.mxu3 %vm167_vm9, %v547_v4  ;;  %1589 = vmatmul.msk.f32.vlgmr.msra.gmra.mxu0 %vm167_vm9, %v547_v4 }
 0x214   :  { %1594 = vmatmul.msk.f32.vlgmr.msra.gmra.mxu2 %vm167_vm9, %v547_v4  ;;  %744 = vmatpush.msrb.mxu3 %v2003_v59 }
 0x215   :  { %770 = vmatpush.msra.mxu0 %v2101_v9  ;;  %815 = vmatpush.msra.mxu2 %v1991_v57 }
 0x216   :  { %745 = vmatpush.msrb.mxu3 %v2008_v60 }
 0x217   :  { %771 = vmatpush.msra.mxu0 %v2108_v10  ;;  %816 = vmatpush.msra.mxu2 %v2041_v2 }
 0x218   :  { %746 = vmatpush.msrb.mxu3 %v2014_v61 }
 0x219   :  { %772 = vmatpush.msra.mxu0 %v2115_v11  ;;  %817 = vmatpush.msra.mxu2 %v2066_v5 }
 0x21a   :  { %747 = vmatpush.msrb.mxu3 %v2026_v0 }
 0x21b   :  { %1599 = vmatmul.msk.f32.vlgmr.msra.gmra.mxu3 %vm167_vm9, %v547_v4  ;;  %773 = vmatpush.msra.mxu0 %v2125_v12 }
 0x21c   :  { %841 = vmatpush.msra.mxu3 %v2020_v62  ;;  %818 = vmatpush.msra.mxu2 %v2085_v7 }
 0x21e   :  { %842 = vmatpush.msra.mxu3 %v2046_v3 }
 0x220   :  { %843 = vmatpush.msra.mxu3 %v2071_v6 }
 0x222   :  { %844 = vmatpush.msra.mxu3 %v2096_v8 }
 0x290   :  { %v600_v14 = vpop.f32.mrf.mxu0 }
 0x291   :  { %v603_v15 = vadd.f32 %v600_v14, %v578_v13 }
 0x293   :  { %1732 = vtanh.f32 %v603_v15 }
 0x296   :  { %v574_v17 = vpop.f32.mrf.mxu3 }
 0x297   :  { %v577_v18 = vadd.f32 %v574_v17, %v549_v16  ;;  %v626_v19 = vpop.f32.mrf.mxu2 }
 0x298   :  { %v629_v20 = vadd.f32 %v626_v19, %v604_v21  ;;  %v795_v21 = vld [vmem:[#allocation2 + $0x18] sm:$0xff] }
 0x299   :  { %v1733_v22 = vpop.eup %1732  ;;  %1734 = vtanh.f32 %v577_v18 }
 0x29a   :  { %v660_v23 = vmul.f32 0.5, %v1733_v22  ;;  %1736 = vtanh.f32 %v629_v20  ;;  %v824_v20 = vld [vmem:[#allocation2 + $0x58] sm:$0xff] }
 0x29c   :  { %v661_v28 = vadd.f32 0.5, %v660_v23 }
 0x29e   :  { %v652_v25 = vpop.f32.mrf.mxu3  ;;  %v666_v32 = vmul.f32 %v661_v28, %v545_v56  ;;  %v876_v28 = vld [vmem:[#allocation2 + $0xd8] sm:$0xff] }
 0x29f   :  { %v1735_v26 = vpop.eup %1734  ;;  %v655_v27 = vadd.f32 %v652_v25, %v630_v24 }
 0x2a0   :  { %v657_v29 = vmul.f32 0.5, %v1735_v26  ;;  %v1737_v31 = vpop.eup %1736  ;;  %v850_v26 = vld [vmem:[#allocation2 + $0x98] sm:$0xff] }
 0x2a1   :  { %1738 = vtanh.f32 %v655_v27 }
 0x2a2   :  { %v658_v30 = vadd.f32 0.5, %v657_v29 }
 0x2a4   :  { %v667_v33 = vmul.f32 %v1737_v31, %v658_v30 }
 0x2a6   :  { %v668_v34 = vadd.f32 %v667_v33, %v666_v32 }
 0x2a7   :  { %v1739_v36 = vpop.eup %1738 }
 0x2a8   :  { %1740 = vtanh.f32 %v668_v34  ;;  %v664_v37 = vmul.f32 0.5, %v1739_v36 }
 0x2aa   :  { %v665_v38 = vadd.f32 0.5, %v664_v37 }
 0x2ae   :  { %v1741_v35 = vpop.eup %1740 }
 0x2af   :  { %v670_v39 = vmul.f32 %v1741_v35, %v665_v38 }
 0x2b1   :  { %671 = vst.msk [vmem:[#allocation3 + $0x8] sm:$0xff] %vm167_vm9, %v670_v39  ;;  %1600 = vmatmul.msk.f32.vlgmr.msrb.gmra.mxu0 %vm167_vm9, %v670_v39  ;;  %1605 = vmatmul.msk.f32.vlgmr.msrb.gmra.mxu2 %vm167_vm9, %v670_v39 }
 0x2b2   :  { %1610 = vmatmul.msk.f32.vlgmr.msrb.gmra.mxu3 %vm167_vm9, %v670_v39  ;;  %867 = vmatpush.msrb.mxu0 %v2003_v59 }
 0x2b3   :  { %893 = vmatpush.msrb.mxu2 %v2101_v9  ;;  %938 = vmatpush.msrb.mxu3 %v1991_v57 }
 0x2b4   :  { %868 = vmatpush.msrb.mxu0 %v2008_v60 }
 0x2b5   :  { %894 = vmatpush.msrb.mxu2 %v2108_v10  ;;  %939 = vmatpush.msrb.mxu3 %v2041_v2 }
 0x2b6   :  { %869 = vmatpush.msrb.mxu0 %v2014_v61 }
 0x2b7   :  { %895 = vmatpush.msrb.mxu2 %v2115_v11  ;;  %940 = vmatpush.msrb.mxu3 %v2066_v5 }
 0x2b8   :  { %870 = vmatpush.msrb.mxu0 %v2026_v0 }
 0x2b9   :  { %1615 = vmatmul.msk.f32.vlgmr.msra.gmra.mxu0 %vm167_vm9, %v670_v39  ;;  %896 = vmatpush.msrb.mxu2 %v2125_v12 }
 0x2ba   :  { %964 = vmatpush.msra.mxu0 %v2020_v62  ;;  %941 = vmatpush.msrb.mxu3 %v2085_v7 }
 0x2bc   :  { %965 = vmatpush.msra.mxu0 %v2046_v3 }
 0x2be   :  { %966 = vmatpush.msra.mxu0 %v2071_v6 }
 0x2c0   :  { %967 = vmatpush.msra.mxu0 %v2096_v8 }
 0x32e   :  { %v697_v41 = vpop.f32.mrf.mxu0 }
 0x32f   :  { %v700_v42 = vadd.f32 %v697_v41, %v672_v40 }
 0x331   :  { %1742 = vtanh.f32 %v700_v42 }
 0x334   :  { %v723_v44 = vpop.f32.mrf.mxu2 }
 0x335   :  { %v726_v45 = vadd.f32 %v723_v44, %v701_v43  ;;  %v749_v47 = vpop.f32.mrf.mxu3 }
 0x336   :  { %v752_v49 = vadd.f32 %v749_v47, %v727_v46  ;;  %v775_v48 = vpop.f32.mrf.mxu0  ;;  %v918_v47 = vld [vmem:[#allocation2 + $0x20] sm:$0xff] }
 0x337   :  { %1744 = vtanh.f32 %v726_v45  ;;  %v1743_v50 = vpop.eup %1742  ;;  %v778_v52 = vadd.f32 %v775_v48, %v753_v51  ;;  %v973_v48 = vld [vmem:[#allocation2 + $0xa0] sm:$0xff] }
 0x338   :  { %1746 = vtanh.f32 %v752_v49  ;;  %v780_v53 = vmul.f32 0.5, %v1743_v50 }
 0x339   :  { %1748 = vtanh.f32 %v778_v52 }
 0x33a   :  { %v781_v58 = vadd.f32 0.5, %v780_v53 }
 0x33d   :  { %v1745_v54 = vpop.eup %1744 }
 0x33e   :  { %v783_v55 = vmul.f32 0.5, %v1745_v54  ;;  %v1747_v56 = vpop.eup %1746 }
 0x33f   :  { %v790_v4 = vmul.f32 %v1747_v56, %v781_v58  ;;  %v1749_v13 = vpop.eup %1748 }
 0x340   :  { %v784_v63 = vadd.f32 0.5, %v783_v55  ;;  %v787_v15 = vmul.f32 0.5, %v1749_v13 }
 0x342   :  { %v789_v1 = vmul.f32 %v784_v63, %v668_v34  ;;  %v788_v16 = vadd.f32 0.5, %v787_v15 }
 0x344   :  { %v791_v14 = vadd.f32 %v790_v4, %v789_v1 }
 0x346   :  { %1750 = vtanh.f32 %v791_v14 }
 0x34c   :  { %v1751_v17 = vpop.eup %1750 }
 0x34d   :  { %v793_v18 = vmul.f32 %v1751_v17, %v788_v16  ;;  %v1041_v17 = vld [vmem:[#allocation2 + $0x28] sm:$0xff] }
 0x34f   :  { %794 = vst.msk [vmem:[#allocation3 + $0x10] sm:$0xff] %vm167_vm9, %v793_v18  ;;  %1616 = vmatmul.msk.f32.vlgmr.msra.gmra.mxu2 %vm167_vm9, %v793_v18  ;;  %1621 = vmatmul.msk.f32.vlgmr.msra.gmra.mxu3 %vm167_vm9, %v793_v18 }
 0x350   :  { %1626 = vmatmul.msk.f32.vlgmr.msrb.gmra.mxu0 %vm167_vm9, %v793_v18  ;;  %990 = vmatpush.msra.mxu2 %v2003_v59 }
 0x351   :  { %1016 = vmatpush.msra.mxu3 %v2101_v9  ;;  %1061 = vmatpush.msrb.mxu0 %v1991_v57 }
 0x352   :  { %991 = vmatpush.msra.mxu2 %v2008_v60 }
 0x353   :  { %1017 = vmatpush.msra.mxu3 %v2108_v10  ;;  %1062 = vmatpush.msrb.mxu0 %v2041_v2 }
 0x354   :  { %992 = vmatpush.msra.mxu2 %v2014_v61 }
 0x355   :  { %1018 = vmatpush.msra.mxu3 %v2115_v11  ;;  %1063 = vmatpush.msrb.mxu0 %v2066_v5 }
 0x356   :  { %993 = vmatpush.msra.mxu2 %v2026_v0 }
 0x357   :  { %1631 = vmatmul.msk.f32.vlgmr.msrb.gmra.mxu2 %vm167_vm9, %v793_v18  ;;  %1019 = vmatpush.msra.mxu3 %v2125_v12 }
 0x358   :  { %1087 = vmatpush.msrb.mxu2 %v2020_v62  ;;  %1064 = vmatpush.msrb.mxu0 %v2085_v7 }
 0x35a   :  { %1088 = vmatpush.msrb.mxu2 %v2046_v3 }
 0x35c   :  { %1089 = vmatpush.msrb.mxu2 %v2071_v6 }
 0x35e   :  { %1090 = vmatpush.msrb.mxu2 %v2096_v8 }
 0x3cd   :  { %v872_v19 = vpop.f32.mrf.mxu0 }
 0x3ce   :  { %v875_v27 = vadd.f32 %v872_v19, %v850_v26  ;;  %v1096_v19 = vld [vmem:[#allocation2 + $0xa8] sm:$0xff] }
 0x3d2   :  { %v820_v22 = vpop.f32.mrf.mxu2  ;;  %v846_v23 = vpop.f32.mrf.mxu3 }
 0x3d3   :  { %v823_v24 = vadd.f32 %v820_v22, %v795_v21  ;;  %v849_v25 = vadd.f32 %v846_v23, %v824_v20  ;;  %v1290_v22 = vld [vmem:[%s2432_s3 + $0x10] sm:$0xff]  ;;  %v1122_v23 = vld [vmem:[#allocation2 + $0xe8] sm:$0xff] }
 0x3d5   :  { %1752 = vtanh.f32 %v823_v24 }
 0x3d6   :  { %1754 = vtanh.f32 %v849_v25 }
 0x3d7   :  { %1756 = vtanh.f32 %v875_v27 }
 0x3da   :  { %v898_v29 = vpop.f32.mrf.mxu2 }
 0x3db   :  { %v1753_v30 = vpop.eup %1752  ;;  %v901_v31 = vadd.f32 %v898_v29, %v876_v28 }
 0x3dc   :  { %v1755_v32 = vpop.eup %1754  ;;  %v903_v33 = vmul.f32 0.5, %v1753_v30 }
 0x3dd   :  { %v906_v34 = vmul.f32 0.5, %v1755_v32  ;;  %1758 = vtanh.f32 %v901_v31  ;;  %v1757_v37 = vpop.eup %1756 }
 0x3de   :  { %v904_v36 = vadd.f32 0.5, %v903_v33 }
 0x3df   :  { %v907_v38 = vadd.f32 0.5, %v906_v34 }
 0x3e0   :  { %v913_v35 = vmul.f32 %v1757_v37, %v904_v36 }
 0x3e1   :  { %v912_v39 = vmul.f32 %v907_v38, %v791_v14 }
 0x3e3   :  { %v1759_v40 = vpop.eup %1758  ;;  %v914_v41 = vadd.f32 %v913_v35, %v912_v39  ;;  %v1289_v39 = vld [vmem:[%s2432_s3 + $0x8] sm:$0xff] }
 0x3e4   :  { %v910_v42 = vmul.f32 0.5, %v1759_v40  ;;  %v1684_v40 = vld [vmem:[%s2432_s3 + $0x38] sm:$0xff] }
 0x3e5   :  { %1760 = vtanh.f32 %v914_v41 }
 0x3e6   :  { %v911_v43 = vadd.f32 0.5, %v910_v42  ;;  %v1694_v42 = vld [vmem:[%s2432_s3 + $0x78] sm:$0xff] }
 0x3eb   :  { %v1761_v44 = vpop.eup %1760 }
 0x3ec   :  { %v916_v45 = vmul.f32 %v1761_v44, %v911_v43  ;;  %v1683_v43 = vld [vmem:[%s2432_s3 + $0x30] sm:$0xff] }
 0x3ed   :  { %v1688_v44 = vld [vmem:[%s2432_s3 + $0x50] sm:$0xff] }
 0x3ee   :  { %917 = vst.msk [vmem:[#allocation3 + $0x18] sm:$0xff] %vm167_vm9, %v916_v45  ;;  %1632 = vmatmul.msk.f32.vlgmr.msrb.gmra.mxu3 %vm167_vm9, %v916_v45  ;;  %1637 = vmatmul.msk.f32.vlgmr.msra.gmra.mxu0 %vm167_vm9, %v916_v45 }
 0x3ef   :  { %1642 = vmatmul.msk.f32.vlgmr.msra.gmra.mxu2 %vm167_vm9, %v916_v45  ;;  %1113 = vmatpush.msrb.mxu3 %v2003_v59 }
 0x3f0   :  { %1139 = vmatpush.msra.mxu0 %v2101_v9  ;;  %1210 = vmatpush.msra.mxu2 %v2020_v62  ;;  %v947_v62 = vld [vmem:[#allocation2 + $0x60] sm:$0xff] }
 0x3f1   :  { %1114 = vmatpush.msrb.mxu3 %v2008_v60 }
 0x3f2   :  { %1140 = vmatpush.msra.mxu0 %v2108_v10  ;;  %1211 = vmatpush.msra.mxu2 %v2046_v3 }
 0x3f3   :  { %1115 = vmatpush.msrb.mxu3 %v2014_v61 }
 0x3f4   :  { %1141 = vmatpush.msra.mxu0 %v2115_v11  ;;  %1212 = vmatpush.msra.mxu2 %v2071_v6 }
 0x3f5   :  { %1116 = vmatpush.msrb.mxu3 %v2026_v0 }
 0x3f6   :  { %1647 = vmatmul.msk.f32.vlgmr.msra.gmra.mxu3 %vm167_vm9, %v916_v45  ;;  %1142 = vmatpush.msra.mxu0 %v2125_v12  ;;  %v1693_v45 = vld [vmem:[%s2432_s3 + $0x70] sm:$0xff] }
 0x3f7   :  { %1236 = vmatpush.msra.mxu3 %v2003_v59  ;;  %1213 = vmatpush.msra.mxu2 %v2096_v8  ;;  %v999_v59 = vld [vmem:[#allocation2 + $0xe0] sm:$0xff] }
 0x3f9   :  { %1237 = vmatpush.msra.mxu3 %v2008_v60 }
 0x3fb   :  { %1238 = vmatpush.msra.mxu3 %v2014_v61 }
 0x46b   :  { %v969_v3 = vpop.f32.mrf.mxu0 }
 0x46c   :  { %v972_v46 = vadd.f32 %v969_v3, %v947_v62  ;;  %v1682_v62 = vld [vmem:[%s2432_s3 + $0x28] sm:$0xff] }
 0x46d   :  { %v1687_v3 = vld [vmem:[%s2432_s3 + $0x48] sm:$0xff] }
 0x46e   :  { %1762 = vtanh.f32 %v972_v46  ;;  %v1692_v46 = vld [vmem:[%s2432_s3 + $0x68] sm:$0xff] }
 0x471   :  { %v943_v6 = vpop.f32.mrf.mxu3 }
 0x472   :  { %v946_v49 = vadd.f32 %v943_v6, %v918_v47  ;;  %v995_v0 = vpop.f32.mrf.mxu2  ;;  %v1164_v47 = vld [vmem:[#allocation2 + $0x30] sm:$0xff] }
 0x473   :  { %v998_v51 = vadd.f32 %v995_v0, %v973_v48  ;;  %v1681_v0 = vld [vmem:[%s2432_s3 + $0x20] sm:$0xff] }
 0x474   :  { %v1763_v50 = vpop.eup %1762  ;;  %1764 = vtanh.f32 %v946_v49  ;;  %v1288_v49 = vld [vmem:[%s2432_s3] sm:$0xff] }
 0x475   :  { %v1029_v52 = vmul.f32 0.5, %v1763_v50  ;;  %1766 = vtanh.f32 %v998_v51  ;;  %v1691_v48 = vld [vmem:[%s2432_s3 + $0x60] sm:$0xff]  ;;  %v1421_v51 = vld [vmem:[%s2435_s5 + $0x18] sm:$0xff] }
 0x477   :  { %v1030_v54 = vadd.f32 0.5, %v1029_v52  ;;  %v1420_v52 = vld [vmem:[%s2435_s5 + $0x10] sm:$0xff] }
 0x479   :  { %v1021_v8 = vpop.f32.mrf.mxu3  ;;  %v1035_v58 = vmul.f32 %v1030_v54, %v914_v41  ;;  %v1689_v41 = vld [vmem:[%s2432_s3 + $0x58] sm:$0xff] }
 0x47a   :  { %v1765_v53 = vpop.eup %1764  ;;  %v1024_v60 = vadd.f32 %v1021_v8, %v999_v59  ;;  %v1419_v59 = vld [vmem:[%s2435_s5 + $0x8] sm:$0xff]  ;;  %v1193_v8 = vld [vmem:[#allocation2 + $0x70] sm:$0xff] }
 0x47b   :  { %v1026_v61 = vmul.f32 0.5, %v1765_v53  ;;  %v1767_v56 = vpop.eup %1766 }
 0x47c   :  { %1768 = vtanh.f32 %v1024_v60  ;;  %v1418_v60 = vld [vmem:[%s2435_s5] sm:$0xff] }
 0x47d   :  { %v1027_v55 = vadd.f32 0.5, %v1026_v61  ;;  %v1219_v61 = vld [vmem:[#allocation2 + $0xb0] sm:$0xff] }
 0x47f   :  { %v1036_v63 = vmul.f32 %v1767_v56, %v1027_v55 }
 0x481   :  { %v1037_v1 = vadd.f32 %v1036_v63, %v1035_v58 }
 0x482   :  { %v1769_v4 = vpop.eup %1768 }
 0x483   :  { %1770 = vtanh.f32 %v1037_v1  ;;  %v1033_v13 = vmul.f32 0.5, %v1769_v4 }
 0x485   :  { %v1034_v14 = vadd.f32 0.5, %v1033_v13 }
 0x489   :  { %v1771_v15 = vpop.eup %1770 }
 0x48a   :  { %v1039_v16 = vmul.f32 %v1771_v15, %v1034_v14 }
 0x48c   :  { %1040 = vst.msk [vmem:[#allocation3 + $0x20] sm:$0xff] %vm167_vm9, %v1039_v16  ;;  %1648 = vmatmul.msk.f32.vlgmr.msrb.gmra.mxu0 %vm167_vm9, %v1039_v16  ;;  %1653 = vmatmul.msk.f32.vlgmr.msrb.gmra.mxu2 %vm167_vm9, %v1039_v16 }
 0x48d   :  { %1658 = vmatmul.msk.f32.vlgmr.msrb.gmra.mxu3 %vm167_vm9, %v1039_v16  ;;  %1184 = vmatpush.msrb.mxu0 %v1991_v57  ;;  %v2309_v57 = vld [vmem:[%s2432_s3 + $0x40] sm:$0xff] }
 0x48e   :  { %1239 = vmatpush.msra.mxu3 %v2309_v57  ;;  %1333 = vmatpush.msrb.mxu2 %v1684_v40  ;;  %v1368_v40 = vld [vmem:[#allocation2 + $0xf8] sm:$0xff] }
 0x48f   :  { %1185 = vmatpush.msrb.mxu0 %v2041_v2 }
 0x490   :  { %1359 = vmatpush.msrb.mxu3 %v1689_v41  ;;  %1334 = vmatpush.msrb.mxu2 %v1683_v43 }
 0x491   :  { %1186 = vmatpush.msrb.mxu0 %v2066_v5  ;;  %v1070_v5 = vld [vmem:[#allocation2 + $0x68] sm:$0xff] }
 0x492   :  { %1360 = vmatpush.msrb.mxu3 %v1688_v44  ;;  %1335 = vmatpush.msrb.mxu2 %v1682_v62 }
 0x493   :  { %1187 = vmatpush.msrb.mxu0 %v2085_v7 }
 0x494   :  { %1663 = vmatmul.msk.f32.vlgmr.msra.gmra.mxu0 %vm167_vm9, %v1039_v16  ;;  %1361 = vmatpush.msrb.mxu3 %v1687_v3 }
 0x495   :  { %1262 = vmatpush.msra.mxu0 %v2101_v9  ;;  %1336 = vmatpush.msrb.mxu2 %v1681_v0 }
 0x496   :  { %1362 = vmatpush.msrb.mxu3 %v2309_v57 }
 0x497   :  { %1263 = vmatpush.msra.mxu0 %v2108_v10 }
 0x499   :  { %1264 = vmatpush.msra.mxu0 %v2115_v11 }
 0x49b   :  { %1265 = vmatpush.msra.mxu0 %v2125_v12  ;;  %v1291_v12 = vld [vmem:[%s2432_s3 + $0x18] sm:$0xff] }
 0x49c   :  { %1307 = vmatpush.msra.mxu1 %v1291_v12  ;;  %v1411_v12 = vld [vmem:[#allocation3 + $0x8] sm:$0xff] }
 0x49e   :  { %1308 = vmatpush.msra.mxu1 %v1290_v22  ;;  %v1412_v22 = vld [vmem:[#allocation3 + $0x10] sm:$0xff] }
 0x4a0   :  { %1309 = vmatpush.msra.mxu1 %v1289_v39 }
 0x4a2   :  { %1310 = vmatpush.msra.mxu1 %v1288_v49 }
 0x4a4   :  { %1462 = vmatpush.msrb.mxu1 %v1421_v51 }
 0x4a6   :  { %1463 = vmatpush.msrb.mxu1 %v1420_v52 }
 0x4a8   :  { %1464 = vmatpush.msrb.mxu1 %v1419_v59 }
 0x4aa   :  { %1465 = vmatpush.msrb.mxu1 %v1418_v60 }
 0x509   :  { %v1066_v18 = vpop.f32.mrf.mxu0 }
 0x50a   :  { %v1069_v2 = vadd.f32 %v1066_v18, %v1041_v17 }
 0x50c   :  { %1772 = vtanh.f32 %v1069_v2 }
 0x50f   :  { %v1092_v7 = vpop.f32.mrf.mxu2 }
 0x510   :  { %v1095_v9 = vadd.f32 %v1092_v7, %v1070_v5  ;;  %v1118_v10 = vpop.f32.mrf.mxu3 }
 0x511   :  { %v1121_v21 = vadd.f32 %v1118_v10, %v1096_v19  ;;  %v1144_v11 = vpop.f32.mrf.mxu0 }
 0x512   :  { %1774 = vtanh.f32 %v1095_v9  ;;  %v1773_v20 = vpop.eup %1772  ;;  %v1147_v24 = vadd.f32 %v1144_v11, %v1122_v23  ;;  %v1410_v11 = vld [vmem:[#allocation3] sm:$0xff] }
 0x513   :  { %1776 = vtanh.f32 %v1121_v21  ;;  %v1149_v25 = vmul.f32 0.5, %v1773_v20  ;;  %v1413_v20 = vld [vmem:[#allocation3 + $0x18] sm:$0xff]  ;;  %v1414_v23 = vld [vmem:[#allocation3 + $0x20] sm:$0xff] }
 0x514   :  { %1778 = vtanh.f32 %v1147_v24 }
 0x515   :  { %v1150_v29 = vadd.f32 0.5, %v1149_v25 }
 0x518   :  { %v1775_v26 = vpop.eup %1774 }
 0x519   :  { %v1152_v27 = vmul.f32 0.5, %v1775_v26  ;;  %v1777_v28 = vpop.eup %1776  ;;  %v1287_v26 = vld [vmem:[#allocation2 + $0x38] sm:$0xff] }
 0x51a   :  { %v1159_v32 = vmul.f32 %v1777_v28, %v1150_v29  ;;  %v1779_v33 = vpop.eup %1778  ;;  %v1721_v29 = vld [vmem:[%s2436_s6] ss:$0 sm:$0xff] }
 0x51b   :  { %v1153_v30 = vadd.f32 0.5, %v1152_v27  ;;  %v1156_v36 = vmul.f32 0.5, %v1779_v33  ;;  %v1342_v33 = vld [vmem:[#allocation2 + $0xb8] sm:$0xff] }
 0x51d   :  { %v1158_v31 = vmul.f32 %v1153_v30, %v1037_v1  ;;  %v1157_v37 = vadd.f32 0.5, %v1156_v36  ;;  %v1245_v1 = vld [vmem:[#allocation2 + $0xf0] sm:$0xff]  ;;  %v1316_v30 = vld [vmem:[#allocation2 + $0x78] sm:$0xff] }
 0x51f   :  { %v2318_v34 = vadd.f32 %v1159_v32, %v1158_v31 }
 0x521   :  { %1780 = vtanh.f32 %v2318_v34 }
 0x527   :  { %v1781_v38 = vpop.eup %1780 }
 0x528   :  { %v1162_v35 = vmul.f32 %v1781_v38, %v1157_v37 }
 0x52a   :  { %1163 = vst.msk [vmem:[#allocation3 + $0x28] sm:$0xff] %vm167_vm9, %v1162_v35  ;;  %1664 = vmatmul.msk.f32.vlgmr.msrb.gmra.mxu0 %vm167_vm9, %v1162_v35  ;;  %1669 = vmatmul.msk.f32.vlgmr.msra.gmra.mxu2 %vm167_vm9, %v1162_v35 }
 0x52b   :  { %1674 = vmatmul.msk.f32.vlgmr.msra.gmra.mxu3 %vm167_vm9, %v1162_v35  ;;  %1385 = vmatpush.msrb.mxu0 %v1694_v42 }
 0x52d   :  { %1386 = vmatpush.msrb.mxu0 %v1693_v45 }
 0x52f   :  { %1387 = vmatpush.msrb.mxu0 %v1692_v46 }
 0x531   :  { %1388 = vmatpush.msrb.mxu0 %v1691_v48  ;;  %v1415_v24 = vld [vmem:[#allocation3 + $0x28] sm:$0xff] }
 0x532   :  { %1679 = vmatmul.msk.f32.vlgmr.msra.gmra.mxu0 %vm167_vm9, %v1162_v35 }
 0x5a7   :  { %v1189_v6 = vpop.f32.mrf.mxu0 }
 0x5a8   :  { %v1192_v50 = vadd.f32 %v1189_v6, %v1164_v47 }
 0x5aa   :  { %1782 = vtanh.f32 %v1192_v50 }
 0x5ad   :  { %v1215_v53 = vpop.f32.mrf.mxu2 }
 0x5ae   :  { %v1218_v54 = vadd.f32 %v1215_v53, %v1193_v8  ;;  %v1241_v55 = vpop.f32.mrf.mxu3 }
 0x5af   :  { %v1244_v56 = vadd.f32 %v1241_v55, %v1219_v61  ;;  %v1267_v58 = vpop.f32.mrf.mxu0 }
 0x5b0   :  { %1784 = vtanh.f32 %v1218_v54  ;;  %v1783_v63 = vpop.eup %1782  ;;  %v1270_v4 = vadd.f32 %v1267_v58, %v1245_v1 }
 0x5b1   :  { %1786 = vtanh.f32 %v1244_v56  ;;  %v1272_v13 = vmul.f32 0.5, %v1783_v63 }
 0x5b2   :  { %1788 = vtanh.f32 %v1270_v4 }
 0x5b3   :  { %v1273_v17 = vadd.f32 0.5, %v1272_v13 }
 0x5b6   :  { %v1785_v14 = vpop.eup %1784 }
 0x5b7   :  { %v1275_v15 = vmul.f32 0.5, %v1785_v14  ;;  %v1787_v16 = vpop.eup %1786 }
 0x5b8   :  { %v1282_v2 = vmul.f32 %v1787_v16, %v1273_v17  ;;  %v1789_v5 = vpop.eup %1788 }
 0x5b9   :  { %v1276_v18 = vadd.f32 0.5, %v1275_v15  ;;  %v1279_v9 = vmul.f32 0.5, %v1789_v5 }
 0x5bb   :  { %v1281_v57 = vmul.f32 %v1276_v18, %v2318_v34  ;;  %v1280_v19 = vadd.f32 0.5, %v1279_v9 }
 0x5bd   :  { %v1283_v7 = vadd.f32 %v1282_v2, %v1281_v57 }
 0x5bf   :  { %1790 = vtanh.f32 %v1283_v7 }
 0x5c5   :  { %v1791_v10 = vpop.eup %1790 }
 0x5c6   :  { %v1285_v21 = vmul.f32 %v1791_v10, %v1280_v19 }
 0x5c8   :  { %1286 = vst.msk [vmem:[#allocation3 + $0x30] sm:$0xff] %vm167_vm9, %v1285_v21  ;;  %1680 = vmatmul.msk.f32.vlgmr.msra.gmra.mxu1 %vm167_vm9, %v1285_v21  ;;  %1685 = vmatmul.msk.f32.vlgmr.msrb.gmra.mxu2 %vm167_vm9, %v1285_v21 }
 0x5c9   :  { %1690 = vmatmul.msk.f32.vlgmr.msrb.gmra.mxu3 %vm167_vm9, %v1285_v21  ;;  %1695 = vmatmul.msk.f32.vlgmr.msrb.gmra.mxu0 %vm167_vm9, %v1285_v21 }
 0x5cf   :  { %v1416_v25 = vld [vmem:[#allocation3 + $0x30] sm:$0xff] }
 0x5d0   :  { %1696 = vmatmul.msk.f32.vlgmr.msrb.gmra.mxu1 %vm167_vm9, %v1410_v11 }
 0x5d8   :  { %1697 = vmatmul.msk.f32.gmra.mxu1 %vm167_vm9, %v1411_v12 }
 0x5e0   :  { %1698 = vmatmul.msk.f32.gmra.mxu1 %vm167_vm9, %v1412_v22 }
 0x5e8   :  { %1699 = vmatmul.msk.f32.gmra.mxu1 %vm167_vm9, %v1413_v20 }
 0x5f0   :  { %1700 = vmatmul.msk.f32.gmra.mxu1 %vm167_vm9, %v1414_v23 }
 0x5f8   :  { %1701 = vmatmul.msk.f32.gmra.mxu1 %vm167_vm9, %v1415_v24 }
 0x600   :  { %1702 = vmatmul.msk.f32.gmra.mxu1 %vm167_vm9, %v1416_v25 }
 0x645   :  { %v1312_v27 = vpop.f32.mrf.mxu1 }
 0x646   :  { %v1315_v28 = vadd.f32 %v1312_v27, %v1287_v26  ;;  %v1390_v38 = vpop.f32.mrf.mxu0 }
 0x647   :  { %v1393_v41 = vadd.f32 %v1390_v38, %v1368_v40 }
 0x648   :  { %1792 = vtanh.f32 %v1315_v28 }
 0x64b   :  { %v1338_v31 = vpop.f32.mrf.mxu2 }
 0x64c   :  { %v1341_v32 = vadd.f32 %v1338_v31, %v1316_v30  ;;  %v1364_v34 = vpop.f32.mrf.mxu3 }
 0x64d   :  { %v1367_v36 = vadd.f32 %v1364_v34, %v1342_v33  ;;  %v1467_v37 = vpop.f32.mrf.mxu1 }
 0x64e   :  { %1794 = vtanh.f32 %v1341_v32  ;;  %v1468_v35 = vadd.f32 %v1721_v29, %v1467_v37  ;;  %v1793_v39 = vpop.eup %1792 }
 0x64f   :  { %1796 = vtanh.f32 %v1367_v36  ;;  %v1395_v42 = vmul.f32 0.5, %v1793_v39 }
 0x650   :  { %1491 = vst [vmem:[%s2437_s9] sm:$0xff] %v1468_v35  ;;  %1798 = vtanh.f32 %v1393_v41 }
 0x651   :  { %v1396_v46 = vadd.f32 0.5, %v1395_v42 }
 0x654   :  { %v1795_v43 = vpop.eup %1794 }
 0x655   :  { %v1398_v44 = vmul.f32 0.5, %v1795_v43  ;;  %v1470_v45 = vpop.f32.mrf.mxu1  ;;  %v1797_v62 = vpop.eup %1796 }
 0x656   :  { %v1471_v3 = vadd.f32 %v1721_v29, %v1470_v45  ;;  %v1405_v49 = vmul.f32 %v1797_v62, %v1396_v46  ;;  %v1799_v0 = vpop.eup %1798 }
 0x657   :  { %v1399_v47 = vadd.f32 0.5, %v1398_v44  ;;  %v1402_v51 = vmul.f32 0.5, %v1799_v0 }
 0x658   :  { %1492 = vst [vmem:[%s2437_s9 + $0x8] sm:$0xff] %v1471_v3 }
 0x659   :  { %v1404_v6 = vmul.f32 %v1399_v47, %v1283_v7  ;;  %v1403_v59 = vadd.f32 0.5, %v1402_v51 }
 0x65b   :  { %v1406_v48 = vadd.f32 %v1405_v49, %v1404_v6 }
 0x65d   :  { %1800 = vtanh.f32 %v1406_v48  ;;  %1500 = vst.msk [vmem:[%s2438_s11] sm:$0xff] %vm167_vm9, %v1406_v48  ;;  %v1473_v50 = vpop.f32.mrf.mxu1 }
 0x65e   :  { %v1474_v52 = vadd.f32 %v1721_v29, %v1473_v50 }
 0x660   :  { %1493 = vst [vmem:[%s2437_s9 + $0x10] sm:$0xff] %v1474_v52 }
 0x663   :  { %v1801_v8 = vpop.eup %1800 }
 0x664   :  { %v1408_v53 = vmul.f32 %v1801_v8, %v1403_v59 }
 0x665   :  { %v1476_v60 = vpop.f32.mrf.mxu1 }
 0x666   :  { %1409 = vst.msk [vmem:[#allocation3 + $0x38] sm:$0xff] %vm167_vm9, %v1408_v53  ;;  %v1477_v54 = vadd.f32 %v1721_v29, %v1476_v60 }
 0x667   :  { %1499 = vst.msk [vmem:[%s2439_s10] sm:$0xff] %vm167_vm9, %v1408_v53 }
 0x668   :  { %1494 = vst [vmem:[%s2437_s9 + $0x18] sm:$0xff] %v1477_v54 }
 0x66d   :  { %v1479_v61 = vpop.f32.mrf.mxu1  ;;  %v1417_v55 = vld [vmem:[#allocation3 + $0x38] sm:$0xff] }
 0x66e   :  { %v1480_v56 = vadd.f32 %v1721_v29, %v1479_v61  ;;  %1703 = vmatmul.msk.f32.gmra.mxu1 %vm167_vm9, %v1417_v55 }
 0x670   :  { %1495 = vst [vmem:[%s2437_s9 + $0x20] sm:$0xff] %v1480_v56 }
 0x675   :  { %v1482_v58 = vpop.f32.mrf.mxu1 }
 0x676   :  { %v1483_v63 = vadd.f32 %v1721_v29, %v1482_v58 }
 0x678   :  { %1496 = vst [vmem:[%s2437_s9 + $0x28] sm:$0xff] %v1483_v63 }
 0x67d   :  { %v1485_v1 = vpop.f32.mrf.mxu1 }
 0x67e   :  { %v1486_v4 = vadd.f32 %v1721_v29, %v1485_v1 }
 0x680   :  { %1497 = vst [vmem:[%s2437_s9 + $0x30] sm:$0xff] %v1486_v4 }
 0x6eb   :  { %v1488_v13 = vpop.f32.mrf.mxu1 }
 0x6ec   :  { %v1489_v14 = vadd.f32 %v1721_v29, %v1488_v13 }
 0x6ee   :  { %1498 = vst [vmem:[%s2437_s9 + $0x38] sm:$0xff] %v1489_v14 }

</bundles_post_ra>
